<compile_context>
chip_gen: v7x
topology: tpu7x:2x2x1
jax: 0.10.0
libtpu: 0.0.40
codegen_flags: <defaults>
</compile_context>

<pallas_src>
import numpy as np
import jax
import jax.numpy as jnp
from jax.experimental import pallas as pl
from jax.experimental.pallas import tpu as pltpu

# Model sizes (spatial 28x28 is forced by the `E*4*4` flatten: 28->24->12->8->4).
M = 4        # conv1 out channels
E = 8        # conv2 out channels
L = 32       # hidden size of the final Linear
IMG = 28
K = 5
OH1 = 24     # conv1 output spatial
PW1 = 12     # pool1 output spatial
OH2 = 8      # conv2 output spatial
PW2 = 4      # pool2 output spatial

C1 = 2 * M * PW1   # 96 conv1 out lanes: [even-x | odd-x], each half = (oc, px)
P1 = M * PW1       # 48 pooled1 lanes (ic, px)
C2 = 2 * E * PW2   # 64 conv2 out lanes: [even-x | odd-x]
P2 = E * PW2       # 32 pooled2 lanes

BLOCK_B = 32       # images per grid step (must be a multiple of 8)


# ------------------------------ fused kernel ------------------------------

def ftex_kernel(x_ref, t1_ref, b1_ref, t2_ref, b2_ref, w3_ref, b3_ref, o_ref):
    f32 = jnp.float32
    b = x_ref.shape[1]                       # per-step batch (static)
    x3 = x_ref[...]                          # (28, B, 28), rows are y-major

    # conv1 (1 -> M, 5x5 valid): 5 accumulated MXU matmuls, batch folded into M.
    # Output lanes already in [even-x | odd-x] pooling layout.
    h1 = jnp.dot(x3[0:OH1].reshape(OH1 * b, IMG), t1_ref[0],
                 preferred_element_type=f32)
    for di in range(1, K):
        h1 = h1 + jnp.dot(x3[di:di + OH1].reshape(OH1 * b, IMG), t1_ref[di],
                          preferred_element_type=f32)
    h1 = jnp.maximum(h1 + b1_ref[...], 0.0)                     # (24B, 96)

    # maxpool1: x-parity = lane halves, y-pairs = leading-dim halves.
    hc = jnp.maximum(h1[:, :P1], h1[:, P1:])                    # (24B, 48)
    hc4 = hc.reshape(PW1, 2, b, P1)
    hp = jnp.maximum(hc4[:, 0], hc4[:, 1])                      # (12, B, 48)

    # conv2 (M -> E, 5x5 valid): contraction over (ic, dj) in the Toeplitz.
    h2 = jnp.dot(hp[0:OH2].reshape(OH2 * b, P1), t2_ref[0],
                 preferred_element_type=f32)
    for di in range(1, K):
        h2 = h2 + jnp.dot(hp[di:di + OH2].reshape(OH2 * b, P1), t2_ref[di],
                          preferred_element_type=f32)
    h2 = jnp.maximum(h2 + b2_ref[...], 0.0)                     # (8B, 64)

    # maxpool2.
    hc2 = jnp.maximum(h2[:, :P2], h2[:, P2:])                   # (8B, 32)
    hc2_4 = hc2.reshape(PW2, 2, b, P2)
    hp2 = jnp.maximum(hc2_4[:, 0], hc2_4[:, 1])                 # (4, B, 32)

    # Linear(E*4*4 -> L) + ReLU: 4 accumulated (B,32)@(32,L) matmuls.
    y = b3_ref[...] + jnp.dot(hp2[0], w3_ref[0], preferred_element_type=f32)
    for r in range(1, PW2):
        y = y + jnp.dot(hp2[r], w3_ref[r], preferred_element_type=f32)
    o_ref[...] = jnp.maximum(y, 0.0)                            # (B, L)


# ------------------------------ wrapper ------------------------------

@jax.jit
def ftex_forward(x, w):
    # x: (1, N, 1, 28, 28); the squeeze dim and channel dim must be exactly 1.
    assert x.ndim == 5 and x.shape[0] == 1 and x.shape[2] == 1 \
        and x.shape[3:] == (IMG, IMG), f"unexpected input shape {x.shape}"
    xs = x[0, :, 0].astype(jnp.float32)                         # (N, 28, 28)
    n = xs.shape[0]
    bb = min(BLOCK_B, ((n + 7) // 8) * 8)                       # per-step batch
    n_pad = ((n + bb - 1) // bb) * bb
    if n_pad != n:
        xs = jnp.pad(xs, ((0, n_pad - n), (0, 0), (0, 0)))
    xt = jnp.transpose(xs, (1, 0, 2))                           # (28, Np, 28) y-major

    out = pl.pallas_call(
        ftex_kernel,
        out_shape=jax.ShapeDtypeStruct((n_pad, L), jnp.float32),
        grid=(n_pad // bb,),
        in_specs=[
            pl.BlockSpec((IMG, bb, IMG), lambda i: (0, i, 0)),   # x (batched block)
            pl.BlockSpec((K, IMG, C1), lambda i: (0, 0, 0)),     # t1
            pl.BlockSpec((1, C1), lambda i: (0, 0)),             # b1row
            pl.BlockSpec((K, P1, C2), lambda i: (0, 0, 0)),      # t2
            pl.BlockSpec((1, C2), lambda i: (0, 0)),             # b2row
            pl.BlockSpec((PW2, P2, L), lambda i: (0, 0, 0)),     # w3
            pl.BlockSpec((1, L), lambda i: (0, 0)),              # b3
        ],
        out_specs=pl.BlockSpec((bb, L), lambda i: (i, 0)),
        compiler_params=pltpu.CompilerParams(
            dimension_semantics=("parallel",)),
    )(xt, w["t1"], w["b1row"], w["t2"], w["b2row"], w["w3"], w["b3"])
    return out[:n]


# -------------------- weight packing (one-time host prep) --------------------

def pack_params(p):
    w1 = np.asarray(p["conv1_w"], np.float32)      # (M, 1, 5, 5)
    b1 = np.asarray(p["conv1_b"], np.float32)      # (M,)
    w2 = np.asarray(p["conv2_w"], np.float32)      # (E, M, 5, 5)
    b2 = np.asarray(p["conv2_b"], np.float32)      # (E,)
    wf = np.asarray(p["fc_w"], np.float32)         # (L, E*16)  (PyTorch Linear layout)
    bf = np.asarray(p["fc_b"], np.float32)         # (L,)

    # conv1 Toeplitz over width; output column layout q*48 + oc*12 + px with
    # q = x-parity (pool1 column selection folded into the conv output layout).
    t1 = np.zeros((K, IMG, C1), np.float32)
    b1row = np.zeros((1, C1), np.float32)
    for di in range(K):
        for q in range(2):
            for oc in range(M):
                for px in range(PW1):
                    ox = 2 * px + q
                    col = q * (M * PW1) + oc * PW1 + px
                    for dj in range(K):
                        t1[di, ox + dj, col] = w1[oc, 0, di, dj]
    for q in range(2):
        for oc in range(M):
            b1row[0, q * (M * PW1) + oc * PW1: q * (M * PW1) + (oc + 1) * PW1] = b1[oc]

    # conv2 Toeplitz: input lanes (ic*12 + px), output lanes q*32 + oc*4 + px.
    t2 = np.zeros((K, P1, C2), np.float32)
    b2row = np.zeros((1, C2), np.float32)
    for di in range(K):
        for q in range(2):
            for oc in range(E):
                for px in range(PW2):
                    ox = 2 * px + q
                    col = q * (E * PW2) + oc * PW2 + px
                    for ic in range(M):
                        for dj in range(K):
                            t2[di, ic * PW1 + ox + dj, col] = w2[oc, ic, di, dj]
    for q in range(2):
        for oc in range(E):
            b2row[0, q * (E * PW2) + oc * PW2: q * (E * PW2) + (oc + 1) * PW2] = b2[oc]

    # fc weight permuted to the in-kernel (row r, lane oc*4+col) layout.
    # PyTorch flatten order (channel, row, col): flat[oc*16 + r*4 + c].
    w3 = np.zeros((PW2, P2, L), np.float32)
    for r in range(PW2):
        for oc in range(E):
            for c in range(PW2):
                w3[r, oc * PW2 + c, :] = wf[:, oc * 16 + r * PW2 + c]
    b3 = bf[None, :]

    packed = {"t1": t1, "b1row": b1row, "t2": t2, "b2row": b2row, "w3": w3, "b3": b3}
    return {k: jnp.asarray(v) for k, v in packed.items()}


# ------------------------------ numpy reference ------------------------------

def reference_forward_np(x5, p):
    x = np.asarray(x5, np.float32).reshape(-1, IMG, IMG)
    w1, b1 = np.asarray(p["conv1_w"]), np.asarray(p["conv1_b"])
    w2, b2 = np.asarray(p["conv2_w"]), np.asarray(p["conv2_b"])
    wf, bf = np.asarray(p["fc_w"]), np.asarray(p["fc_b"])
    n = x.shape[0]

    h1 = np.zeros((n, M, OH1, OH1), np.float32)
    for di in range(K):
        for dj in range(K):
            h1 += w1[None, :, 0, di, dj, None, None] * x[:, None, di:di + OH1, dj:dj + OH1]
    h1 = np.maximum(h1 + b1[None, :, None, None], 0.0)
    h1p = h1.reshape(n, M, PW1, 2, PW1, 2).max(axis=(3, 5))

    h2 = np.zeros((n, E, OH2, OH2), np.float32)
    for di in range(K):
        for dj in range(K):
            h2 += np.einsum("oi,nihw->nohw", w2[:, :, di, dj],
                            h1p[:, :, di:di + OH2, dj:dj + OH2])
    h2 = np.maximum(h2 + b2[None, :, None, None], 0.0)
    h2p = h2.reshape(n, E, PW2, 2, PW2, 2).max(axis=(3, 5))

    flat = h2p.reshape(n, E * 16)
    return np.maximum(flat @ wf.T + bf[None, :], 0.0)


# ------------------------------ main ------------------------------

if __name__ == "__main__":
    key = jax.random.PRNGKey(0)
    ks = jax.random.split(key, 8)
    params = {
        "conv1_w": 0.2 * jax.random.normal(ks[0], (M, 1, K, K), jnp.float32),
        "conv1_b": 0.1 * jax.random.normal(ks[1], (M,), jnp.float32),
        "conv2_w": 0.1 * jax.random.normal(ks[2], (E, M, K, K), jnp.float32),
        "conv2_b": 0.1 * jax.random.normal(ks[3], (E,), jnp.float32),
        "fc_w": 0.1 * jax.random.normal(ks[4], (L, E * 16), jnp.float32),
        "fc_b": 0.1 * jax.random.normal(ks[5], (L,), jnp.float32),
    }
    packed = pack_params(params)

    # Small bag (matches ftEx usage): (1, N=2, 1, 28, 28).
    x_small = jax.random.normal(ks[6], (1, 2, 1, IMG, IMG), jnp.float32)
    out_small = jax.block_until_ready(ftex_forward(x_small, packed))
    assert out_small.shape == (2, L)
    ref_small = reference_forward_np(np.asarray(x_small), params)
    np.testing.assert_allclose(np.asarray(out_small), ref_small, rtol=1e-3, atol=1e-3)

    # Larger bag: exercises multiple grid steps + batch padding.
    x_big = jax.random.normal(ks[7], (1, 70, 1, IMG, IMG), jnp.float32)
    out_big = jax.block_until_ready(ftex_forward(x_big, packed))
    assert out_big.shape == (70, L)
    ref_big = reference_forward_np(np.asarray(x_big), params)
    np.testing.assert_allclose(np.asarray(out_big), ref_big, rtol=1e-3, atol=1e-3)

    print("KERNEL_OK")
</pallas_src>

<mosaic_0001>
module attributes {stable_mosaic.version = 11 : i64} {
  func.func @ftex_kernel(%arg0: i32, %arg1: memref<28x8x28xf32, #tpu.memory_space<vmem>>, %arg2: memref<5x28x96xf32, #tpu.memory_space<vmem>>, %arg3: memref<1x96xf32, #tpu.memory_space<vmem>>, %arg4: memref<5x48x64xf32, #tpu.memory_space<vmem>>, %arg5: memref<1x64xf32, #tpu.memory_space<vmem>>, %arg6: memref<4x32x32xf32, #tpu.memory_space<vmem>>, %arg7: memref<1x32xf32, #tpu.memory_space<vmem>>, %arg8: memref<8x32xf32, #tpu.memory_space<vmem>>) attributes {dimension_semantics = [#tpu.dimension_semantics<parallel>], iteration_bounds = array<i64: 1>, scalar_prefetch = 0 : i64, scratch_operands = 0 : i64, tpu.core_type = #tpu.core_type<tc>, window_params = [{transform_indices = @transform_0, window_bounds = array<i64: 28, 8, 28>}, {pipeline_mode = #tpu.pipeline_mode<synchronous>, transform_indices = @transform_1, window_bounds = array<i64: 5, 28, 96>}, {pipeline_mode = #tpu.pipeline_mode<synchronous>, transform_indices = @transform_2, window_bounds = array<i64: 1, 96>}, {pipeline_mode = #tpu.pipeline_mode<synchronous>, transform_indices = @transform_3, window_bounds = array<i64: 5, 48, 64>}, {pipeline_mode = #tpu.pipeline_mode<synchronous>, transform_indices = @transform_4, window_bounds = array<i64: 1, 64>}, {pipeline_mode = #tpu.pipeline_mode<synchronous>, transform_indices = @transform_5, window_bounds = array<i64: 4, 32, 32>}, {pipeline_mode = #tpu.pipeline_mode<synchronous>, transform_indices = @transform_6, window_bounds = array<i64: 1, 32>}, {transform_indices = @transform_7, window_bounds = array<i64: 8, 32>}]} {
    %c0 = arith.constant 0 : index
    %c0_0 = arith.constant 0 : index
    %c0_1 = arith.constant 0 : index
    %0 = vector.load %arg1[%c0, %c0_0, %c0_1] : memref<28x8x28xf32, #tpu.memory_space<vmem>>, vector<28x8x28xf32>
    %1 = vector.extract_strided_slice %0 {offsets = [0, 0, 0], sizes = [24, 8, 28], strides = [1, 1, 1]} : vector<28x8x28xf32> to vector<24x8x28xf32>
    %2 = vector.shape_cast %1 : vector<24x8x28xf32> to vector<192x28xf32>
    %c0_2 = arith.constant 0 : index
    %c0_3 = arith.constant 0 : index
    %c0_4 = arith.constant 0 : index
    %3 = vector.load %arg2[%c0_2, %c0_3, %c0_4] : memref<5x28x96xf32, #tpu.memory_space<vmem>>, vector<1x28x96xf32>
    %4 = vector.shape_cast %3 : vector<1x28x96xf32> to vector<28x96xf32>
    %cst = arith.constant dense<0.000000e+00> : vector<192x96xf32>
    %5 = tpu.matmul %2, %4, %cst {dimension_numbers = #tpu.dot_dimension_numbers<[1], [0], [0], [1], [0, 0, 1, 1], [], []>} : vector<192x28xf32>, vector<28x96xf32>, vector<192x96xf32> -> vector<192x96xf32>
    %6 = vector.extract_strided_slice %0 {offsets = [1, 0, 0], sizes = [24, 8, 28], strides = [1, 1, 1]} : vector<28x8x28xf32> to vector<24x8x28xf32>
    %7 = vector.shape_cast %6 : vector<24x8x28xf32> to vector<192x28xf32>
    %c1 = arith.constant 1 : index
    %c0_5 = arith.constant 0 : index
    %c0_6 = arith.constant 0 : index
    %8 = vector.load %arg2[%c1, %c0_5, %c0_6] : memref<5x28x96xf32, #tpu.memory_space<vmem>>, vector<1x28x96xf32>
    %9 = vector.shape_cast %8 : vector<1x28x96xf32> to vector<28x96xf32>
    %cst_7 = arith.constant dense<0.000000e+00> : vector<192x96xf32>
    %10 = tpu.matmul %7, %9, %cst_7 {dimension_numbers = #tpu.dot_dimension_numbers<[1], [0], [0], [1], [0, 0, 1, 1], [], []>} : vector<192x28xf32>, vector<28x96xf32>, vector<192x96xf32> -> vector<192x96xf32>
    %11 = arith.addf %5, %10 : vector<192x96xf32>
    %12 = vector.extract_strided_slice %0 {offsets = [2, 0, 0], sizes = [24, 8, 28], strides = [1, 1, 1]} : vector<28x8x28xf32> to vector<24x8x28xf32>
    %13 = vector.shape_cast %12 : vector<24x8x28xf32> to vector<192x28xf32>
    %c2 = arith.constant 2 : index
    %c0_8 = arith.constant 0 : index
    %c0_9 = arith.constant 0 : index
    %14 = vector.load %arg2[%c2, %c0_8, %c0_9] : memref<5x28x96xf32, #tpu.memory_space<vmem>>, vector<1x28x96xf32>
    %15 = vector.shape_cast %14 : vector<1x28x96xf32> to vector<28x96xf32>
    %cst_10 = arith.constant dense<0.000000e+00> : vector<192x96xf32>
    %16 = tpu.matmul %13, %15, %cst_10 {dimension_numbers = #tpu.dot_dimension_numbers<[1], [0], [0], [1], [0, 0, 1, 1], [], []>} : vector<192x28xf32>, vector<28x96xf32>, vector<192x96xf32> -> vector<192x96xf32>
    %17 = arith.addf %11, %16 : vector<192x96xf32>
    %18 = vector.extract_strided_slice %0 {offsets = [3, 0, 0], sizes = [24, 8, 28], strides = [1, 1, 1]} : vector<28x8x28xf32> to vector<24x8x28xf32>
    %19 = vector.shape_cast %18 : vector<24x8x28xf32> to vector<192x28xf32>
    %c3 = arith.constant 3 : index
    %c0_11 = arith.constant 0 : index
    %c0_12 = arith.constant 0 : index
    %20 = vector.load %arg2[%c3, %c0_11, %c0_12] : memref<5x28x96xf32, #tpu.memory_space<vmem>>, vector<1x28x96xf32>
    %21 = vector.shape_cast %20 : vector<1x28x96xf32> to vector<28x96xf32>
    %cst_13 = arith.constant dense<0.000000e+00> : vector<192x96xf32>
    %22 = tpu.matmul %19, %21, %cst_13 {dimension_numbers = #tpu.dot_dimension_numbers<[1], [0], [0], [1], [0, 0, 1, 1], [], []>} : vector<192x28xf32>, vector<28x96xf32>, vector<192x96xf32> -> vector<192x96xf32>
    %23 = arith.addf %17, %22 : vector<192x96xf32>
    %24 = vector.extract_strided_slice %0 {offsets = [4, 0, 0], sizes = [24, 8, 28], strides = [1, 1, 1]} : vector<28x8x28xf32> to vector<24x8x28xf32>
    %25 = vector.shape_cast %24 : vector<24x8x28xf32> to vector<192x28xf32>
    %c4 = arith.constant 4 : index
    %c0_14 = arith.constant 0 : index
    %c0_15 = arith.constant 0 : index
    %26 = vector.load %arg2[%c4, %c0_14, %c0_15] : memref<5x28x96xf32, #tpu.memory_space<vmem>>, vector<1x28x96xf32>
    %27 = vector.shape_cast %26 : vector<1x28x96xf32> to vector<28x96xf32>
    %cst_16 = arith.constant dense<0.000000e+00> : vector<192x96xf32>
    %28 = tpu.matmul %25, %27, %cst_16 {dimension_numbers = #tpu.dot_dimension_numbers<[1], [0], [0], [1], [0, 0, 1, 1], [], []>} : vector<192x28xf32>, vector<28x96xf32>, vector<192x96xf32> -> vector<192x96xf32>
    %29 = arith.addf %23, %28 : vector<192x96xf32>
    %c0_17 = arith.constant 0 : index
    %c0_18 = arith.constant 0 : index
    %30 = vector.load %arg3[%c0_17, %c0_18] : memref<1x96xf32, #tpu.memory_space<vmem>>, vector<1x96xf32>
    %31 = vector.broadcast %30 : vector<1x96xf32> to vector<192x96xf32>
    %32 = arith.addf %29, %31 : vector<192x96xf32>
    %cst_19 = arith.constant 0.000000e+00 : f32
    %33 = vector.broadcast %cst_19 : f32 to vector<192x96xf32>
    %34 = arith.maximumf %32, %33 : vector<192x96xf32>
    %35 = vector.extract_strided_slice %34 {offsets = [0, 0], sizes = [192, 48], strides = [1, 1]} : vector<192x96xf32> to vector<192x48xf32>
    %36 = vector.extract_strided_slice %34 {offsets = [0, 48], sizes = [192, 48], strides = [1, 1]} : vector<192x96xf32> to vector<192x48xf32>
    %37 = arith.maximumf %35, %36 : vector<192x48xf32>
    %38 = vector.shape_cast %37 : vector<192x48xf32> to vector<12x2x8x48xf32>
    %39 = vector.extract_strided_slice %38 {offsets = [0, 0, 0, 0], sizes = [12, 1, 8, 48], strides = [1, 1, 1, 1]} : vector<12x2x8x48xf32> to vector<12x1x8x48xf32>
    %40 = vector.shape_cast %39 : vector<12x1x8x48xf32> to vector<12x8x48xf32>
    %41 = vector.extract_strided_slice %38 {offsets = [0, 1, 0, 0], sizes = [12, 1, 8, 48], strides = [1, 1, 1, 1]} : vector<12x2x8x48xf32> to vector<12x1x8x48xf32>
    %42 = vector.shape_cast %41 : vector<12x1x8x48xf32> to vector<12x8x48xf32>
    %43 = arith.maximumf %40, %42 : vector<12x8x48xf32>
    %44 = vector.extract_strided_slice %43 {offsets = [0, 0, 0], sizes = [8, 8, 48], strides = [1, 1, 1]} : vector<12x8x48xf32> to vector<8x8x48xf32>
    %45 = vector.shape_cast %44 : vector<8x8x48xf32> to vector<64x48xf32>
    %c0_20 = arith.constant 0 : index
    %c0_21 = arith.constant 0 : index
    %c0_22 = arith.constant 0 : index
    %46 = vector.load %arg4[%c0_20, %c0_21, %c0_22] : memref<5x48x64xf32, #tpu.memory_space<vmem>>, vector<1x48x64xf32>
    %47 = vector.shape_cast %46 : vector<1x48x64xf32> to vector<48x64xf32>
    %cst_23 = arith.constant dense<0.000000e+00> : vector<64x64xf32>
    %48 = tpu.matmul %45, %47, %cst_23 {dimension_numbers = #tpu.dot_dimension_numbers<[1], [0], [0], [1], [0, 0, 1, 1], [], []>} : vector<64x48xf32>, vector<48x64xf32>, vector<64x64xf32> -> vector<64x64xf32>
    %49 = vector.extract_strided_slice %43 {offsets = [1, 0, 0], sizes = [8, 8, 48], strides = [1, 1, 1]} : vector<12x8x48xf32> to vector<8x8x48xf32>
    %50 = vector.shape_cast %49 : vector<8x8x48xf32> to vector<64x48xf32>
    %c1_24 = arith.constant 1 : index
    %c0_25 = arith.constant 0 : index
    %c0_26 = arith.constant 0 : index
    %51 = vector.load %arg4[%c1_24, %c0_25, %c0_26] : memref<5x48x64xf32, #tpu.memory_space<vmem>>, vector<1x48x64xf32>
    %52 = vector.shape_cast %51 : vector<1x48x64xf32> to vector<48x64xf32>
    %cst_27 = arith.constant dense<0.000000e+00> : vector<64x64xf32>
    %53 = tpu.matmul %50, %52, %cst_27 {dimension_numbers = #tpu.dot_dimension_numbers<[1], [0], [0], [1], [0, 0, 1, 1], [], []>} : vector<64x48xf32>, vector<48x64xf32>, vector<64x64xf32> -> vector<64x64xf32>
    %54 = arith.addf %48, %53 : vector<64x64xf32>
    %55 = vector.extract_strided_slice %43 {offsets = [2, 0, 0], sizes = [8, 8, 48], strides = [1, 1, 1]} : vector<12x8x48xf32> to vector<8x8x48xf32>
    %56 = vector.shape_cast %55 : vector<8x8x48xf32> to vector<64x48xf32>
    %c2_28 = arith.constant 2 : index
    %c0_29 = arith.constant 0 : index
    %c0_30 = arith.constant 0 : index
    %57 = vector.load %arg4[%c2_28, %c0_29, %c0_30] : memref<5x48x64xf32, #tpu.memory_space<vmem>>, vector<1x48x64xf32>
    %58 = vector.shape_cast %57 : vector<1x48x64xf32> to vector<48x64xf32>
    %cst_31 = arith.constant dense<0.000000e+00> : vector<64x64xf32>
    %59 = tpu.matmul %56, %58, %cst_31 {dimension_numbers = #tpu.dot_dimension_numbers<[1], [0], [0], [1], [0, 0, 1, 1], [], []>} : vector<64x48xf32>, vector<48x64xf32>, vector<64x64xf32> -> vector<64x64xf32>
    %60 = arith.addf %54, %59 : vector<64x64xf32>
    %61 = vector.extract_strided_slice %43 {offsets = [3, 0, 0], sizes = [8, 8, 48], strides = [1, 1, 1]} : vector<12x8x48xf32> to vector<8x8x48xf32>
    %62 = vector.shape_cast %61 : vector<8x8x48xf32> to vector<64x48xf32>
    %c3_32 = arith.constant 3 : index
    %c0_33 = arith.constant 0 : index
    %c0_34 = arith.constant 0 : index
    %63 = vector.load %arg4[%c3_32, %c0_33, %c0_34] : memref<5x48x64xf32, #tpu.memory_space<vmem>>, vector<1x48x64xf32>
    %64 = vector.shape_cast %63 : vector<1x48x64xf32> to vector<48x64xf32>
    %cst_35 = arith.constant dense<0.000000e+00> : vector<64x64xf32>
    %65 = tpu.matmul %62, %64, %cst_35 {dimension_numbers = #tpu.dot_dimension_numbers<[1], [0], [0], [1], [0, 0, 1, 1], [], []>} : vector<64x48xf32>, vector<48x64xf32>, vector<64x64xf32> -> vector<64x64xf32>
    %66 = arith.addf %60, %65 : vector<64x64xf32>
    %67 = vector.extract_strided_slice %43 {offsets = [4, 0, 0], sizes = [8, 8, 48], strides = [1, 1, 1]} : vector<12x8x48xf32> to vector<8x8x48xf32>
    %68 = vector.shape_cast %67 : vector<8x8x48xf32> to vector<64x48xf32>
    %c4_36 = arith.constant 4 : index
    %c0_37 = arith.constant 0 : index
    %c0_38 = arith.constant 0 : index
    %69 = vector.load %arg4[%c4_36, %c0_37, %c0_38] : memref<5x48x64xf32, #tpu.memory_space<vmem>>, vector<1x48x64xf32>
    %70 = vector.shape_cast %69 : vector<1x48x64xf32> to vector<48x64xf32>
    %cst_39 = arith.constant dense<0.000000e+00> : vector<64x64xf32>
    %71 = tpu.matmul %68, %70, %cst_39 {dimension_numbers = #tpu.dot_dimension_numbers<[1], [0], [0], [1], [0, 0, 1, 1], [], []>} : vector<64x48xf32>, vector<48x64xf32>, vector<64x64xf32> -> vector<64x64xf32>
    %72 = arith.addf %66, %71 : vector<64x64xf32>
    %c0_40 = arith.constant 0 : index
    %c0_41 = arith.constant 0 : index
    %73 = vector.load %arg5[%c0_40, %c0_41] : memref<1x64xf32, #tpu.memory_space<vmem>>, vector<1x64xf32>
    %74 = vector.broadcast %73 : vector<1x64xf32> to vector<64x64xf32>
    %75 = arith.addf %72, %74 : vector<64x64xf32>
    %cst_42 = arith.constant 0.000000e+00 : f32
    %76 = vector.broadcast %cst_42 : f32 to vector<64x64xf32>
    %77 = arith.maximumf %75, %76 : vector<64x64xf32>
    %78 = vector.extract_strided_slice %77 {offsets = [0, 0], sizes = [64, 32], strides = [1, 1]} : vector<64x64xf32> to vector<64x32xf32>
    %79 = vector.extract_strided_slice %77 {offsets = [0, 32], sizes = [64, 32], strides = [1, 1]} : vector<64x64xf32> to vector<64x32xf32>
    %80 = arith.maximumf %78, %79 : vector<64x32xf32>
    %81 = vector.shape_cast %80 : vector<64x32xf32> to vector<4x2x8x32xf32>
    %82 = vector.extract_strided_slice %81 {offsets = [0, 0, 0, 0], sizes = [4, 1, 8, 32], strides = [1, 1, 1, 1]} : vector<4x2x8x32xf32> to vector<4x1x8x32xf32>
    %83 = vector.shape_cast %82 : vector<4x1x8x32xf32> to vector<4x8x32xf32>
    %84 = vector.extract_strided_slice %81 {offsets = [0, 1, 0, 0], sizes = [4, 1, 8, 32], strides = [1, 1, 1, 1]} : vector<4x2x8x32xf32> to vector<4x1x8x32xf32>
    %85 = vector.shape_cast %84 : vector<4x1x8x32xf32> to vector<4x8x32xf32>
    %86 = arith.maximumf %83, %85 : vector<4x8x32xf32>
    %c0_43 = arith.constant 0 : index
    %c0_44 = arith.constant 0 : index
    %87 = vector.load %arg7[%c0_43, %c0_44] : memref<1x32xf32, #tpu.memory_space<vmem>>, vector<1x32xf32>
    %88 = vector.extract_strided_slice %86 {offsets = [0, 0, 0], sizes = [1, 8, 32], strides = [1, 1, 1]} : vector<4x8x32xf32> to vector<1x8x32xf32>
    %89 = vector.shape_cast %88 : vector<1x8x32xf32> to vector<8x32xf32>
    %c0_45 = arith.constant 0 : index
    %c0_46 = arith.constant 0 : index
    %c0_47 = arith.constant 0 : index
    %90 = vector.load %arg6[%c0_45, %c0_46, %c0_47] : memref<4x32x32xf32, #tpu.memory_space<vmem>>, vector<1x32x32xf32>
    %91 = vector.shape_cast %90 : vector<1x32x32xf32> to vector<32x32xf32>
    %cst_48 = arith.constant dense<0.000000e+00> : vector<8x32xf32>
    %92 = tpu.matmul %89, %91, %cst_48 {dimension_numbers = #tpu.dot_dimension_numbers<[1], [0], [0], [1], [0, 0, 1, 1], [], []>} : vector<8x32xf32>, vector<32x32xf32>, vector<8x32xf32> -> vector<8x32xf32>
    %93 = vector.broadcast %87 : vector<1x32xf32> to vector<8x32xf32>
    %94 = arith.addf %93, %92 : vector<8x32xf32>
    %95 = vector.extract_strided_slice %86 {offsets = [1, 0, 0], sizes = [1, 8, 32], strides = [1, 1, 1]} : vector<4x8x32xf32> to vector<1x8x32xf32>
    %96 = vector.shape_cast %95 : vector<1x8x32xf32> to vector<8x32xf32>
    %c1_49 = arith.constant 1 : index
    %c0_50 = arith.constant 0 : index
    %c0_51 = arith.constant 0 : index
    %97 = vector.load %arg6[%c1_49, %c0_50, %c0_51] : memref<4x32x32xf32, #tpu.memory_space<vmem>>, vector<1x32x32xf32>
    %98 = vector.shape_cast %97 : vector<1x32x32xf32> to vector<32x32xf32>
    %cst_52 = arith.constant dense<0.000000e+00> : vector<8x32xf32>
    %99 = tpu.matmul %96, %98, %cst_52 {dimension_numbers = #tpu.dot_dimension_numbers<[1], [0], [0], [1], [0, 0, 1, 1], [], []>} : vector<8x32xf32>, vector<32x32xf32>, vector<8x32xf32> -> vector<8x32xf32>
    %100 = arith.addf %94, %99 : vector<8x32xf32>
    %101 = vector.extract_strided_slice %86 {offsets = [2, 0, 0], sizes = [1, 8, 32], strides = [1, 1, 1]} : vector<4x8x32xf32> to vector<1x8x32xf32>
    %102 = vector.shape_cast %101 : vector<1x8x32xf32> to vector<8x32xf32>
    %c2_53 = arith.constant 2 : index
    %c0_54 = arith.constant 0 : index
    %c0_55 = arith.constant 0 : index
    %103 = vector.load %arg6[%c2_53, %c0_54, %c0_55] : memref<4x32x32xf32, #tpu.memory_space<vmem>>, vector<1x32x32xf32>
    %104 = vector.shape_cast %103 : vector<1x32x32xf32> to vector<32x32xf32>
    %cst_56 = arith.constant dense<0.000000e+00> : vector<8x32xf32>
    %105 = tpu.matmul %102, %104, %cst_56 {dimension_numbers = #tpu.dot_dimension_numbers<[1], [0], [0], [1], [0, 0, 1, 1], [], []>} : vector<8x32xf32>, vector<32x32xf32>, vector<8x32xf32> -> vector<8x32xf32>
    %106 = arith.addf %100, %105 : vector<8x32xf32>
    %107 = vector.extract_strided_slice %86 {offsets = [3, 0, 0], sizes = [1, 8, 32], strides = [1, 1, 1]} : vector<4x8x32xf32> to vector<1x8x32xf32>
    %108 = vector.shape_cast %107 : vector<1x8x32xf32> to vector<8x32xf32>
    %c3_57 = arith.constant 3 : index
    %c0_58 = arith.constant 0 : index
    %c0_59 = arith.constant 0 : index
    %109 = vector.load %arg6[%c3_57, %c0_58, %c0_59] : memref<4x32x32xf32, #tpu.memory_space<vmem>>, vector<1x32x32xf32>
    %110 = vector.shape_cast %109 : vector<1x32x32xf32> to vector<32x32xf32>
    %cst_60 = arith.constant dense<0.000000e+00> : vector<8x32xf32>
    %111 = tpu.matmul %108, %110, %cst_60 {dimension_numbers = #tpu.dot_dimension_numbers<[1], [0], [0], [1], [0, 0, 1, 1], [], []>} : vector<8x32xf32>, vector<32x32xf32>, vector<8x32xf32> -> vector<8x32xf32>
    %112 = arith.addf %106, %111 : vector<8x32xf32>
    %cst_61 = arith.constant 0.000000e+00 : f32
    %113 = vector.broadcast %cst_61 : f32 to vector<8x32xf32>
    %114 = arith.maximumf %112, %113 : vector<8x32xf32>
    %c0_62 = arith.constant 0 : index
    %c0_63 = arith.constant 0 : index
    %115 = vector.load %arg8[%c0_62, %c0_63] : memref<8x32xf32, #tpu.memory_space<vmem>>, vector<8x32xf32>
    tpu.vector_store %arg8[%c0_62, %c0_63], %114 {strides = array<i32>} : memref<8x32xf32, #tpu.memory_space<vmem>>, vector<8x32xf32>,
    return
  }
  func.func @transform_0(%arg0: i32) -> (i32, i32, i32) {
    %c0_i32 = arith.constant 0 : i32
    %c0_i32_0 = arith.constant 0 : i32
    %c0_i32_1 = arith.constant 0 : i32
    return %c0_i32, %arg0, %c0_i32_0 : i32, i32, i32
  }
  func.func @transform_1(%arg0: i32) -> (i32, i32, i32) {
    %c0_i32 = arith.constant 0 : i32
    %c0_i32_0 = arith.constant 0 : i32
    %c0_i32_1 = arith.constant 0 : i32
    %c0_i32_2 = arith.constant 0 : i32
    return %c0_i32, %c0_i32_0, %c0_i32_1 : i32, i32, i32
  }
  func.func @transform_2(%arg0: i32) -> (i32, i32) {
    %c0_i32 = arith.constant 0 : i32
    %c0_i32_0 = arith.constant 0 : i32
    %c0_i32_1 = arith.constant 0 : i32
    return %c0_i32, %c0_i32_0 : i32, i32
  }
  func.func @transform_3(%arg0: i32) -> (i32, i32, i32) {
    %c0_i32 = arith.constant 0 : i32
    %c0_i32_0 = arith.constant 0 : i32
    %c0_i32_1 = arith.constant 0 : i32
    %c0_i32_2 = arith.constant 0 : i32
    return %c0_i32, %c0_i32_0, %c0_i32_1 : i32, i32, i32
  }
  func.func @transform_4(%arg0: i32) -> (i32, i32) {
    %c0_i32 = arith.constant 0 : i32
    %c0_i32_0 = arith.constant 0 : i32
    %c0_i32_1 = arith.constant 0 : i32
    return %c0_i32, %c0_i32_0 : i32, i32
  }
  func.func @transform_5(%arg0: i32) -> (i32, i32, i32) {
    %c0_i32 = arith.constant 0 : i32
    %c0_i32_0 = arith.constant 0 : i32
    %c0_i32_1 = arith.constant 0 : i32
    %c0_i32_2 = arith.constant 0 : i32
    return %c0_i32, %c0_i32_0, %c0_i32_1 : i32, i32, i32
  }
  func.func @transform_6(%arg0: i32) -> (i32, i32) {
    %c0_i32 = arith.constant 0 : i32
    %c0_i32_0 = arith.constant 0 : i32
    %c0_i32_1 = arith.constant 0 : i32
    return %c0_i32, %c0_i32_0 : i32, i32
  }
  func.func @transform_7(%arg0: i32) -> (i32, i32) {
    %c0_i32 = arith.constant 0 : i32
    %c0_i32_0 = arith.constant 0 : i32
    return %arg0, %c0_i32 : i32, i32
  }
}

</mosaic_0001>

<bundles_post_ra>
// kernel: ftex_forward.1
= control target key start
LH: loop header
LB: loop body
LE: loop exit
PB: predicated region body
PF: predicated region fallthrough
CT: control target
= control target key end

     0   :  { %12 = vsyncpa [#allocation3], 0  ;;  %s3526_s24 = smov [#allocation2]   ;;  %s4519_s0 = inlined_call_operand.vmem [shape: f32[28,8,28], index: 0, kind: input, shape index: {}]   ;;  %s4520_s1 = inlined_call_operand.vmem [shape: f32[5,28,96], index: 1, kind: input, shape index: {}]   ;;  %s4521_s2 = inlined_call_operand.vmem [shape: f32[1,96], index: 2, kind: input, shape index: {}]   ;;  %s4522_s3 = inlined_call_operand.vmem [shape: f32[5,48,64], index: 3, kind: input, shape index: {}]   ;;  %s4523_s4 = inlined_call_operand.vmem [shape: f32[1,64], index: 4, kind: input, shape index: {}]   ;;  %s4524_s5 = inlined_call_operand.hbm [shape: f32[4,32,32], index: 5, kind: input, shape index: {}]   ;;  %s4525_s6 = inlined_call_operand.vmem [shape: f32[1,32], index: 6, kind: input, shape index: {}]   ;;  %s4526_s7 = inlined_call_operand.vmem [shape: f32[8,32], index: 7, kind: output, shape index: {}]  }
   0x1   :  { %s28_s25 = sshll.u32 %s3526_s24, 4  ;;  %s3502_s28 = scalar_lea.hbm %s4524_s5, 2048  ;;  %s29_s25 = int_to_ptr.vmem [resolvable:$true] %s28_s25 }
   0x2   :  { %p3503_p0 = scmp.ne.s32.totalorder %s4524_s5, %s3502_s28  ;;  %p3506_p1 = scmp.lt.u32.totalorder %s3502_s28, %s4524_s5 }
   0x4   :  { %p3508_p2 = pnand %p3506_p1, %p3503_p0 }
   0x6   :  { %3511 = shalt.err (!%p3508_p2)
}
   0x7   :  { %s3512_s10 = scalar_lea.vmem %s29_s25, 2048  ;;  %p3517_p4 = scmp.lt.s32.totalorder %s29_s25, %s29_s25 }
   0x8   :  { %p3513_p3 = scmp.ne.s32.totalorder %s29_s25, %s3512_s10  ;;  %p3518_p5 = scmp.lt.s32.totalorder %s3512_s10, %s3512_s10 }
   0xa   :  { %p3519_p6 = por %p3518_p5, %p3517_p4 }
   0xc   :  { %p3520_p7 = pnand %p3519_p6, %p3513_p3 }
   0xe   :  { %3523 = shalt.err (!%p3520_p7)
}
   0xf   :  { %s3527_s11 = smov 128   ;;  %s3528_s12 = smov 8  }
  0x10   :  { %34 = dma.hbm_to_vmem [thread:$0]  %s4524_s5, 2048, %s29_s25, [#allocation3], %s3527_s11, %s3527_s11, %s3528_s12  }
  0x11   :  { %3524 = dma.done.wait [#allocation3], 2048  }
  0x12   :  { %3525 = vsyncadd [#allocation3], 4294965248  ;;  %vm150_vm0 = vcmask 1043456   ;;  %vm77_vm1 = vcmask 228352   ;;  %v68_v0 = vld [vmem:[%s4520_s1] sm:$0xff]  ;;  %v69_v1 = vld [vmem:[%s4520_s1 + $0x8] sm:$0xff] }
  0x13   :  { %v70_v2 = vld [vmem:[%s4520_s1 + $0x10] sm:$0xff]  ;;  %v3230_v3 = vpack.c.bf16 %v69_v1, %v68_v0  ;;  %v71_v4 = vld [vmem:[%s4520_s1 + $0x18] sm:$0xf]  ;;  %v40_v5 = vld [vmem:[%s4519_s0] sm:$0xff]  ;;  %vm3529_vm2 = vmmov 1   ;;  %s3530_s26 = smov 80  }
  0x14   :  { %v41_v6 = vld [vmem:[%s4519_s0 + $0x8] sm:$0xff]  ;;  %vm3605_vm3 = vmpackc.low %vm150_vm0, %vm3529_vm2  ;;  %v3234_v8 = vpack.c.bf16 %v71_v4, %v70_v2  ;;  %2888 = vmatprep.mubr.msk.f32.mxu0 %vm77_vm1, %v40_v5  ;;  %v2448_v9 = vld [vmem:[%s4520_s1 + $0x40] sm:$0xff]  ;;  %vm1390_vm4 = vcmask 392192   ;;  %vm3532_vm5 = vmmov 0   ;;  %s3534_s5 = smov 96   ;;  %vm2069_vm6 = vcmask 261120  }
  0x15   :  { %v2449_v10 = vld [vmem:[%s4520_s1 + $0x48] sm:$0xff]  ;;  %2844 = vmatprep.mubr.msk.f32.mxu1 %vm77_vm1, %v41_v6  ;;  %3231 = vmatprep.subr.bf16.mxu0 %v3230_v3  ;;  %v2450_v12 = vld [vmem:[%s4520_s1 + $0x50] sm:$0xff]  ;;  %v2451_v13 = vld [vmem:[%s4520_s1 + $0x58] sm:$0xf] }
  0x16   :  { %3233 = vmatpush3.bf16.msra.mxu0 %v3230_v3  ;;  %v3240_v11 = vpack.c.bf16 %v2449_v10, %v2448_v9  ;;  %v42_v14 = vld [vmem:[%s4519_s0 + $0x10] sm:$0xff]  ;;  %v3244_v15 = vpack.c.bf16 %v2451_v13, %v2450_v12  ;;  %v2477_v16 = vld [vmem:[%s4520_s1 + $0x60] sm:$0xff]  ;;  %v2478_v17 = vld [vmem:[%s4520_s1 + $0x68] sm:$0xff] }
  0x17   :  { %3236 = vmatprep.subr.msk.bf16.mxu0 %vm3605_vm3, %v3234_v8  ;;  %v3641_v18 = vld [vmem:[%s4519_s0 + $0x18] sm:$0xff]  ;;  %v3646_v19 = vld [vmem:[%s4519_s0 + $0x20] sm:$0xff]  ;;  %v3250_v20 = vpack.c.bf16 %v2478_v17, %v2477_v16  ;;  %v2395_v22 = vld [vmem:[%s4520_s1 + $0x28] sm:$0xff] }
  0x18   :  { %v2394_v21 = vld [vmem:[%s4520_s1 + $0x20] sm:$0xff]  ;;  %v2396_v24 = vld [vmem:[%s4520_s1 + $0x30] sm:$0xff]  ;;  %v2397_v25 = vld [vmem:[%s4520_s1 + $0x38] sm:$0xf] }
  0x19   :  { %v3220_v23 = vpack.c.bf16 %v2395_v22, %v2394_v21  ;;  %v3224_v26 = vpack.c.bf16 %v2397_v25, %v2396_v24  ;;  %v3669_v27 = vld [vmem:[%s4519_s0 + $0x28] sm:$0xff]  ;;  %v3676_v28 = vld [vmem:[%s4519_s0 + $0x30] sm:$0xff]  ;;  %v3687_v29 = vld [vmem:[%s4519_s0 + $0x38] sm:$0xff] }
  0x1a   :  { %3239 = vmatpush3.bf16.msk.msra.mxu0 %vm3605_vm3, %v3234_v8  ;;  %v3692_v30 = vld [vmem:[%s4519_s0 + $0x40] sm:$0xff]  ;;  %v3703_v31 = vld [vmem:[%s4519_s0 + $0x48] sm:$0xff]  ;;  %v3708_v32 = vld [vmem:[%s4519_s0 + $0x50] sm:$0xff] }
  0x1b   :  { %3241 = vmatprep.subr.bf16.mxu0 %v3240_v11  ;;  %3221 = vmatprep.subr.bf16.mxu1 %v3220_v23  ;;  %v3722_v33 = vld [vmem:[%s4519_s0 + $0x58] sm:$0xff]  ;;  %v3727_v34 = vld [vmem:[%s4519_s0 + $0x60] sm:$0xff]  ;;  %v3742_v35 = vld [vmem:[%s4519_s0 + $0x68] sm:$0xff] }
  0x1c   :  { %3223 = vmatpush3.bf16.msra.mxu1 %v3220_v23  ;;  %v3747_v36 = vld [vmem:[%s4519_s0 + $0x70] sm:$0xff]  ;;  %v3760_v37 = vld [vmem:[%s4519_s0 + $0x78] sm:$0xff]  ;;  %v2506_v41 = vld [vmem:[%s4520_s1 + $0x80] sm:$0xff] }
  0x1d   :  { %2889 = vmatmul.mubr.msk.f32.vlgmr.msra.gmra.mrb[0].mxu0 %vm77_vm1, %v41_v6  ;;  %3226 = vmatprep.subr.msk.bf16.mxu1 %vm3605_vm3, %v3224_v26  ;;  %v2479_v38 = vld [vmem:[%s4520_s1 + $0x70] sm:$0xff]  ;;  %v2480_v39 = vld [vmem:[%s4520_s1 + $0x78] sm:$0xf]  ;;  %v2507_v42 = vld [vmem:[%s4520_s1 + $0x88] sm:$0xff] }
  0x1e   :  { %3243 = vmatpush3.bf16.msra.mxu0 %v3240_v11  ;;  %2891 = vmatprep.mubr.msk.f32.mxu0 %vm77_vm1, %v42_v14  ;;  %v3254_v40 = vpack.c.bf16 %v2480_v39, %v2479_v38  ;;  %v3260_v43 = vpack.c.bf16 %v2507_v42, %v2506_v41  ;;  %v3812_v44 = vld [vmem:[%s4519_s0 + $0x80] sm:$0xff]  ;;  %v3817_v45 = vld [vmem:[%s4519_s0 + $0x88] sm:$0xff]  ;;  %v3830_v46 = vld [vmem:[%s4519_s0 + $0x90] sm:$0xff] }
  0x1f   :  { %3246 = vmatprep.subr.msk.bf16.mxu0 %vm3605_vm3, %v3244_v15  ;;  %v3835_v47 = vld [vmem:[%s4519_s0 + $0x98] sm:$0xff]  ;;  %v3848_v48 = vld [vmem:[%s4519_s0 + $0xa0] sm:$0xff]  ;;  %v3853_v49 = vld [vmem:[%s4519_s0 + $0xa8] sm:$0xff] }
  0x20   :  { %3229 = vmatpush3.bf16.msk.msra.mxu1 %vm3605_vm3, %v3224_v26  ;;  %v3866_v50 = vld [vmem:[%s4519_s0 + $0xb0] sm:$0xff]  ;;  %v3871_v51 = vld [vmem:[%s4519_s0 + $0xb8] sm:$0xff]  ;;  %v3884_v52 = vld [vmem:[%s4519_s0 + $0xc0] sm:$0xff] }
  0x21   :  { %2892 = vmatmul.mubr.msk.f32.gmra.mrb[2].mxu0 %vm77_vm1, %v3641_v18  ;;  %3354 = vmatprep.subr.bf16.mxu1 %v3230_v3  ;;  %v65_v53 = vld [vmem:[%s4519_s0 + $0xc8] sm:$0xff]  ;;  %v2508_v54 = vld [vmem:[%s4520_s1 + $0x90] sm:$0xff]  ;;  %v2509_v55 = vld [vmem:[%s4520_s1 + $0x98] sm:$0xf] }
  0x22   :  { %2894 = vmatprep.mubr.msk.f32.mxu0 %vm77_vm1, %v3646_v19  ;;  %3249 = vmatpush3.bf16.msk.msra.mxu0 %vm3605_vm3, %v3244_v15  ;;  %v3264_v56 = vpack.c.bf16 %v2509_v55, %v2508_v54  ;;  %v66_v57 = vld [vmem:[%s4519_s0 + $0xd0] sm:$0xff]  ;;  %v67_v58 = vld [vmem:[%s4519_s0 + $0xd8] sm:$0xff]  ;;  %v2538_v22 = vld [vmem:[%s4522_s3 + $0x40] sm:$0xff] }
  0x23   :  { %3251 = vmatprep.subr.bf16.mxu0 %v3250_v20  ;;  %2845 = vmatmul.mubr.msk.f32.vlgmr.msra.gmra.mrb[0].mxu1 %vm77_vm1, %v42_v14  ;;  %v2539_v23 = vld [vmem:[%s4522_s3 + $0x48] sm:$0xff] }
  0x24   :  { %2847 = vmatprep.mubr.msk.f32.mxu1 %vm77_vm1, %v3641_v18  ;;  %3356 = vmatpush3.bf16.msra.mxu1 %v3230_v3  ;;  %v3274_v25 = vpack.c.bf16 %v2539_v23, %v2538_v22 }
  0x25   :  { %2895 = vmatmul.mubr.msk.f32.gmra.mrb[4].mxu0 %vm77_vm1, %v3669_v27  ;;  %3355 = vmatprep.subr.msk.bf16.mxu1 %vm3605_vm3, %v3234_v8 }
  0x26   :  { %2897 = vmatprep.mubr.msk.f32.mxu0 %vm77_vm1, %v3676_v28 }
  0x27   :  { %2848 = vmatmul.mubr.msk.f32.gmra.mrb[2].mxu1 %vm77_vm1, %v3646_v19 }
  0x28   :  { %2850 = vmatprep.mubr.msk.f32.mxu1 %vm77_vm1, %v3669_v27  ;;  %3357 = vmatpush3.bf16.msk.msra.mxu1 %vm3605_vm3, %v3234_v8 }
  0x29   :  { %2898 = vmatmul.mubr.msk.f32.gmra.mrb[6].mxu0 %vm77_vm1, %v3687_v29 }
  0x2a   :  { %2900 = vmatprep.mubr.msk.f32.mxu0 %vm77_vm1, %v3692_v30 }
  0x2b   :  { %2851 = vmatmul.mubr.msk.f32.gmra.mrb[4].mxu1 %vm77_vm1, %v3676_v28 }
  0x2c   :  { %2853 = vmatprep.mubr.msk.f32.mxu1 %vm77_vm1, %v3687_v29 }
  0x2d   :  { %2901 = vmatmul.mubr.msk.f32.gmra.mrb[8].mxu0 %vm77_vm1, %v3703_v31 }
  0x2e   :  { %2903 = vmatprep.mubr.msk.f32.mxu0 %vm77_vm1, %v3708_v32 }
  0x2f   :  { %2854 = vmatmul.mubr.msk.f32.gmra.mrb[6].mxu1 %vm77_vm1, %v3692_v30 }
  0x30   :  { %2856 = vmatprep.mubr.msk.f32.mxu1 %vm77_vm1, %v3703_v31 }
  0x31   :  { %2904 = vmatmul.mubr.msk.f32.gmra.mrb[10].mxu0 %vm77_vm1, %v3722_v33 }
  0x32   :  { %2906 = vmatprep.mubr.msk.f32.mxu0 %vm77_vm1, %v3727_v34 }
  0x33   :  { %2857 = vmatmul.mubr.msk.f32.gmra.mrb[8].mxu1 %vm77_vm1, %v3708_v32 }
  0x34   :  { %2859 = vmatprep.mubr.msk.f32.mxu1 %vm77_vm1, %v3722_v33 }
  0x35   :  { %2907 = vmatmul.mubr.msk.f32.gmra.mrb[12].mxu0 %vm77_vm1, %v3742_v35 }
  0x36   :  { %2909 = vmatprep.mubr.msk.f32.mxu0 %vm77_vm1, %v3747_v36 }
  0x37   :  { %2860 = vmatmul.mubr.msk.f32.gmra.mrb[10].mxu1 %vm77_vm1, %v3727_v34 }
  0x38   :  { %2862 = vmatprep.mubr.msk.f32.mxu1 %vm77_vm1, %v3742_v35 }
  0x39   :  { %2910 = vmatmul.mubr.msk.f32.gmra.mrb[14].mxu0 %vm77_vm1, %v3760_v37 }
  0x3a   :  { %2932 = vmatprep.mubr.msk.f32.mxu0 %vm77_vm1, %v42_v14 }
  0x3b   :  { %2863 = vmatmul.mubr.msk.f32.gmra.mrb[12].mxu1 %vm77_vm1, %v3747_v36 }
  0x3c   :  { %2865 = vmatprep.mubr.msk.f32.mxu1 %vm77_vm1, %v3760_v37 }
  0x3d   :  { %2933 = vmatmul.mubr.msk.f32.vlgmr.msra.gmra.mrb[0].mxu0 %vm77_vm1, %v3641_v18 }
  0x3e   :  { %3253 = vmatpush3.bf16.msra.mxu0 %v3250_v20  ;;  %2935 = vmatprep.mubr.msk.f32.mxu0 %vm77_vm1, %v3646_v19  ;;  %v2537_v20 = vld [vmem:[%s4522_s3 + $0x38] sm:$0xff] }
  0x3f   :  { %3256 = vmatprep.subr.msk.bf16.mxu0 %vm3605_vm3, %v3254_v40  ;;  %2866 = vmatmul.mubr.msk.f32.gmra.mrb[14].mxu1 %vm77_vm1, %v3812_v44 }
  0x40   :  { %2868 = vmatprep.mubr.msk.f32.mxu1 %vm77_vm1, %v3817_v45 }
  0x41   :  { %2936 = vmatmul.mubr.msk.f32.gmra.mrb[2].mxu0 %vm77_vm1, %v3669_v27 }
  0x42   :  { %2938 = vmatprep.mubr.msk.f32.mxu0 %vm77_vm1, %v3676_v28  ;;  %3259 = vmatpush3.bf16.msk.msra.mxu0 %vm3605_vm3, %v3254_v40 }
  0x43   :  { %3261 = vmatprep.subr.bf16.mxu0 %v3260_v43  ;;  %2869 = vmatmul.mubr.msk.f32.gmra.mrb[16].mxu1 %vm77_vm1, %v3830_v46 }
  0x44   :  { %2871 = vmatprep.mubr.msk.f32.mxu1 %vm77_vm1, %v3835_v47 }
  0x45   :  { %2939 = vmatmul.mubr.msk.f32.gmra.mrb[4].mxu0 %vm77_vm1, %v3687_v29 }
  0x46   :  { %2941 = vmatprep.mubr.msk.f32.mxu0 %vm77_vm1, %v3692_v30 }
  0x47   :  { %2872 = vmatmul.mubr.msk.f32.gmra.mrb[18].mxu1 %vm77_vm1, %v3848_v48 }
  0x48   :  { %2874 = vmatprep.mubr.msk.f32.mxu1 %vm77_vm1, %v3853_v49 }
  0x49   :  { %2942 = vmatmul.mubr.msk.f32.gmra.mrb[6].mxu0 %vm77_vm1, %v3703_v31 }
  0x4a   :  { %2944 = vmatprep.mubr.msk.f32.mxu0 %vm77_vm1, %v3708_v32 }
  0x4b   :  { %2875 = vmatmul.mubr.msk.f32.gmra.mrb[20].mxu1 %vm77_vm1, %v3866_v50 }
  0x4c   :  { %2877 = vmatprep.mubr.msk.f32.mxu1 %vm77_vm1, %v3871_v51 }
  0x4d   :  { %2945 = vmatmul.mubr.msk.f32.gmra.mrb[8].mxu0 %vm77_vm1, %v3722_v33 }
  0x4e   :  { %2947 = vmatprep.mubr.msk.f32.mxu0 %vm77_vm1, %v3727_v34 }
  0x4f   :  { %2878 = vmatmul.mubr.msk.f32.gmra.mrb[22].mxu1 %vm77_vm1, %v3884_v52 }
  0x50   :  { %2912 = vmatprep.mubr.msk.f32.mxu1 %vm77_vm1, %v3812_v44 }
  0x51   :  { %2948 = vmatmul.mubr.msk.f32.gmra.mrb[10].mxu0 %vm77_vm1, %v3742_v35 }
  0x52   :  { %2950 = vmatprep.mubr.msk.f32.mxu0 %vm77_vm1, %v3747_v36 }
  0x53   :  { %2913 = vmatmul.mubr.msk.f32.vlgmr.msra.gmra.mrb[16].mxu1 %vm77_vm1, %v3817_v45 }
  0x54   :  { %2915 = vmatprep.mubr.msk.f32.mxu1 %vm77_vm1, %v3830_v46 }
  0x55   :  { %2951 = vmatmul.mubr.msk.f32.gmra.mrb[12].mxu0 %vm77_vm1, %v3760_v37 }
  0x56   :  { %2953 = vmatprep.mubr.msk.f32.mxu0 %vm77_vm1, %v3812_v44 }
  0x57   :  { %2916 = vmatmul.mubr.msk.f32.gmra.mrb[18].mxu1 %vm77_vm1, %v3835_v47 }
  0x58   :  { %2918 = vmatprep.mubr.msk.f32.mxu1 %vm77_vm1, %v3848_v48 }
  0x59   :  { %2954 = vmatmul.mubr.msk.f32.gmra.mrb[14].mxu0 %vm77_vm1, %v3817_v45 }
  0x5a   :  { %2956 = vmatprep.mubr.msk.f32.mxu0 %vm77_vm1, %v3830_v46 }
  0x5b   :  { %2919 = vmatmul.mubr.msk.f32.gmra.mrb[20].mxu1 %vm77_vm1, %v3853_v49 }
  0x5c   :  { %2921 = vmatprep.mubr.msk.f32.mxu1 %vm77_vm1, %v3866_v50 }
  0x5d   :  { %2957 = vmatmul.mubr.msk.f32.gmra.mrb[16].mxu0 %vm77_vm1, %v3835_v47 }
  0x5e   :  { %2959 = vmatprep.mubr.msk.f32.mxu0 %vm77_vm1, %v3848_v48 }
  0x5f   :  { %2922 = vmatmul.mubr.msk.f32.gmra.mrb[22].mxu1 %vm77_vm1, %v3871_v51 }
  0x61   :  { %2960 = vmatmul.mubr.msk.f32.gmra.mrb[18].mxu0 %vm77_vm1, %v3853_v49 }
  0x62   :  { %2962 = vmatprep.mubr.msk.f32.mxu0 %vm77_vm1, %v3866_v50 }
  0x65   :  { %2963 = vmatmul.mubr.msk.f32.gmra.mrb[20].mxu0 %vm77_vm1, %v3871_v51 }
  0x66   :  { %2965 = vmatprep.mubr.msk.f32.mxu0 %vm77_vm1, %v3884_v52 }
  0x69   :  { %2966 = vmatmul.mubr.msk.f32.gmra.mrb[22].mxu0 %vm77_vm1, %v65_v53 }
  0x6a   :  { %2976 = vmatprep.mubr.msk.f32.mxu0 %vm77_vm1, %v3641_v18 }
  0x6d   :  { %2977 = vmatmul.mubr.msk.f32.vlgmr.msra.gmra.mrb[0].mxu0 %vm77_vm1, %v3646_v19 }
  0x6e   :  { %3263 = vmatpush3.bf16.msra.mxu0 %v3260_v43  ;;  %2979 = vmatprep.mubr.msk.f32.mxu0 %vm77_vm1, %v3669_v27 }
  0x6f   :  { %3266 = vmatprep.subr.msk.bf16.mxu0 %vm3605_vm3, %v3264_v56 }
  0x71   :  { %2980 = vmatmul.mubr.msk.f32.gmra.mrb[2].mxu0 %vm77_vm1, %v3676_v28 }
  0x72   :  { %2982 = vmatprep.mubr.msk.f32.mxu0 %vm77_vm1, %v3687_v29  ;;  %3269 = vmatpush3.bf16.msk.msra.mxu0 %vm3605_vm3, %v3264_v56 }
  0x75   :  { %2983 = vmatmul.mubr.msk.f32.gmra.mrb[4].mxu0 %vm77_vm1, %v3692_v30 }
  0x76   :  { %2985 = vmatprep.mubr.msk.f32.mxu0 %vm77_vm1, %v3703_v31 }
  0x79   :  { %2986 = vmatmul.mubr.msk.f32.gmra.mrb[6].mxu0 %vm77_vm1, %v3708_v32 }
  0x7a   :  { %2988 = vmatprep.mubr.msk.f32.mxu0 %vm77_vm1, %v3722_v33 }
  0x7d   :  { %2989 = vmatmul.mubr.msk.f32.gmra.mrb[8].mxu0 %vm77_vm1, %v3727_v34 }
  0x7e   :  { %2991 = vmatprep.mubr.msk.f32.mxu0 %vm77_vm1, %v3742_v35 }
  0x81   :  { %2992 = vmatmul.mubr.msk.f32.gmra.mrb[10].mxu0 %vm77_vm1, %v3747_v36 }
  0x82   :  { %2994 = vmatprep.mubr.msk.f32.mxu0 %vm77_vm1, %v3760_v37 }
  0x85   :  { %2995 = vmatmul.mubr.msk.f32.gmra.mrb[12].mxu0 %vm77_vm1, %v3812_v44 }
  0x86   :  { %2997 = vmatprep.mubr.msk.f32.mxu0 %vm77_vm1, %v3817_v45 }
  0x89   :  { %2998 = vmatmul.mubr.msk.f32.gmra.mrb[14].mxu0 %vm77_vm1, %v3830_v46 }
  0x8a   :  { %3000 = vmatprep.mubr.msk.f32.mxu0 %vm77_vm1, %v3835_v47 }
  0x8d   :  { %3001 = vmatmul.mubr.msk.f32.gmra.mrb[16].mxu0 %vm77_vm1, %v3848_v48 }
  0x8e   :  { %3003 = vmatprep.mubr.msk.f32.mxu0 %vm77_vm1, %v3853_v49 }
  0x91   :  { %3004 = vmatmul.mubr.msk.f32.gmra.mrb[18].mxu0 %vm77_vm1, %v3866_v50 }
  0x92   :  { %3006 = vmatprep.mubr.msk.f32.mxu0 %vm77_vm1, %v3871_v51 }
  0x95   :  { %3007 = vmatmul.mubr.msk.f32.gmra.mrb[20].mxu0 %vm77_vm1, %v3884_v52 }
  0x96   :  { %3009 = vmatprep.mubr.msk.f32.mxu0 %vm77_vm1, %v65_v53 }
  0x99   :  { %3010 = vmatmul.mubr.msk.f32.gmra.mrb[22].mxu0 %vm77_vm1, %v66_v57 }
  0x9a   :  { %3020 = vmatprep.mubr.msk.f32.mxu0 %vm77_vm1, %v3646_v19  ;;  %v2536_v19 = vld [vmem:[%s4522_s3 + $0x30] sm:$0xff] }
  0x9b   :  { %v3270_v21 = vpack.c.bf16 %v2537_v20, %v2536_v19 }
  0x9d   :  { %3021 = vmatmul.mubr.msk.f32.vlgmr.msra.gmra.mrb[0].mxu0 %vm77_vm1, %v3669_v27  ;;  %3271 = vmatprep.subr.bf16.mxu1 %v3270_v21 }
  0x9e   :  { %3023 = vmatprep.mubr.msk.f32.mxu0 %vm77_vm1, %v3676_v28  ;;  %3273 = vmatpush3.bf16.msra.mxu1 %v3270_v21 }
  0x9f   :  { %3275 = vmatprep.subr.bf16.mxu1 %v3274_v25 }
  0xa1   :  { %3024 = vmatmul.mubr.msk.f32.gmra.mrb[2].mxu0 %vm77_vm1, %v3687_v29  ;;  %v2540_v29 = vld [vmem:[%s4522_s3 + $0x50] sm:$0xff] }
  0xa2   :  { %3026 = vmatprep.mubr.msk.f32.mxu0 %vm77_vm1, %v3692_v30  ;;  %3277 = vmatpush3.bf16.msra.mxu1 %v3274_v25  ;;  %v2541_v30 = vld [vmem:[%s4522_s3 + $0x58] sm:$0xff] }
  0xa5   :  { %3027 = vmatmul.mubr.msk.f32.gmra.mrb[4].mxu0 %vm77_vm1, %v3703_v31 }
  0xa6   :  { %3029 = vmatprep.mubr.msk.f32.mxu0 %vm77_vm1, %v3708_v32  ;;  %v3278_v32 = vpack.c.bf16 %v2541_v30, %v2540_v29 }
  0xa8   :  { %3279 = vmatprep.subr.bf16.mxu1 %v3278_v32 }
  0xa9   :  { %3030 = vmatmul.mubr.msk.f32.gmra.mrb[6].mxu0 %vm77_vm1, %v3722_v33  ;;  %3281 = vmatpush3.bf16.msra.mxu1 %v3278_v32 }
  0xaa   :  { %3032 = vmatprep.mubr.msk.f32.mxu0 %vm77_vm1, %v3727_v34 }
  0xad   :  { %3033 = vmatmul.mubr.msk.f32.gmra.mrb[8].mxu0 %vm77_vm1, %v3742_v35  ;;  %v4088_v35 = vld [vmem:[%s4521_s2] ss:$0 sm:$0xff] }
  0xae   :  { %3035 = vmatprep.mubr.msk.f32.mxu0 %vm77_vm1, %v3747_v36 }
  0xb1   :  { %3036 = vmatmul.mubr.msk.f32.gmra.mrb[10].mxu0 %vm77_vm1, %v3760_v37 }
  0xb2   :  { %3038 = vmatprep.mubr.msk.f32.mxu0 %vm77_vm1, %v3812_v44 }
  0xb5   :  { %3039 = vmatmul.mubr.msk.f32.gmra.mrb[12].mxu0 %vm77_vm1, %v3817_v45 }
  0xb6   :  { %3041 = vmatprep.mubr.msk.f32.mxu0 %vm77_vm1, %v3830_v46 }
  0xb9   :  { %3042 = vmatmul.mubr.msk.f32.gmra.mrb[14].mxu0 %vm77_vm1, %v3835_v47 }
  0xba   :  { %3044 = vmatprep.mubr.msk.f32.mxu0 %vm77_vm1, %v3848_v48 }
  0xbd   :  { %3045 = vmatmul.mubr.msk.f32.gmra.mrb[16].mxu0 %vm77_vm1, %v3853_v49 }
  0xbe   :  { %3047 = vmatprep.mubr.msk.f32.mxu0 %vm77_vm1, %v3866_v50 }
  0xc1   :  { %3048 = vmatmul.mubr.msk.f32.gmra.mrb[18].mxu0 %vm77_vm1, %v3871_v51 }
  0xc2   :  { %3050 = vmatprep.mubr.msk.f32.mxu0 %vm77_vm1, %v3884_v52 }
  0xc5   :  { %3051 = vmatmul.mubr.msk.f32.gmra.mrb[20].mxu0 %vm77_vm1, %v65_v53 }
  0xc6   :  { %3053 = vmatprep.mubr.msk.f32.mxu0 %vm77_vm1, %v66_v57 }
  0xc9   :  { %3054 = vmatmul.mubr.msk.f32.gmra.mrb[22].mxu0 %vm77_vm1, %v67_v58 }
  0xf6   :  { %v2846_v59 = vpop.f32.mrb[0].mxu1 }
  0xf7   :  { %v220_v60 = vpop.f32.mrb[1].mxu1 }
  0xfa   :  { %v2849_v61 = vpop.f32.mrb[2].mxu1 }
  0xfb   :  { %v230_v62 = vpop.f32.mrb[3].mxu1 }
  0xfe   :  { %v2852_v63 = vpop.f32.mrb[4].mxu1 }
  0xff   :  { %v240_v0 = vpop.f32.mrb[5].mxu1 }
 0x102   :  { %v2855_v1 = vpop.f32.mrb[6].mxu1 }
 0x103   :  { %v250_v2 = vpop.f32.mrb[7].mxu1 }
 0x106   :  { %v4031_v3 = vpop.f32.mrb[8].mxu1 }
 0x107   :  { %v4033_v4 = vpop.f32.mrb[9].mxu1 }
 0x10a   :  { %v4035_v5 = vpop.f32.mrb[10].mxu1 }
 0x10b   :  { %v4037_v6 = vpop.f32.mrb[11].mxu1 }
 0x10e   :  { %v4039_v7 = vpop.f32.mrb[12].mxu1 }
 0x10f   :  { %v4041_v8 = vpop.f32.mrb[13].mxu1 }
 0x112   :  { %v4043_v9 = vpop.f32.mrb[14].mxu1 }
 0x113   :  { %v4045_v10 = vpop.f32.mrb[15].mxu1 }
 0x126   :  { %v4047_v11 = vpop.f32.mrb[16].mxu1 }
 0x127   :  { %v4049_v12 = vpop.f32.mrb[17].mxu1 }
 0x12a   :  { %v4051_v13 = vpop.f32.mrb[18].mxu1 }
 0x12b   :  { %v4053_v14 = vpop.f32.mrb[19].mxu1 }
 0x12e   :  { %v4055_v15 = vpop.f32.mrb[20].mxu1 }
 0x12f   :  { %v4057_v16 = vpop.f32.mrb[21].mxu1 }
 0x132   :  { %v4059_v17 = vpop.f32.mrb[22].mxu1 }
 0x133   :  { %v4061_v18 = vpop.f32.mrb[23].mxu1 }
 0x170   :  { %v3022_v24 = vpop.f32.mrb[0].mxu0 }
 0x171   :  { %v4075_v26 = vadd.f32 %v3022_v24, %v2846_v59  ;;  %v1047_v27 = vpop.f32.mrb[1].mxu0 }
 0x172   :  { %v4077_v28 = vadd.f32 %v1047_v27, %v220_v60 }
 0x174   :  { %v3025_v31 = vpop.f32.mrb[2].mxu0 }
 0x175   :  { %v3360_v33 = vadd.f32 %v3025_v31, %v2849_v61  ;;  %v1057_v34 = vpop.f32.mrb[3].mxu0 }
 0x176   :  { %v3361_v36 = vadd.f32 %v1057_v34, %v230_v62 }
 0x177   :  { %v4091_v37 = vadd.f32 %v3360_v33, %v4088_v35 }
 0x178   :  { %v3028_v38 = vpop.f32.mrb[4].mxu0  ;;  %v4094_v39 = vadd.f32 %v3361_v36, %v4088_v35 }
 0x179   :  { %v3362_v40 = vadd.f32 %v3028_v38, %v2852_v63  ;;  %v1067_v41 = vpop.f32.mrb[5].mxu0  ;;  %v1224_v42 = vmax.f32 %v4091_v37, 0.0 }
 0x17a   :  { %v3363_v43 = vadd.f32 %v1067_v41, %v240_v0  ;;  %v1223_v46 = vmax.f32 %v4094_v39, 0.0 }
 0x17b   :  { %1275 = vrot.lane.b32.xlu0 %v1224_v42, %s3530_s26  ;;  %v4101_v44 = vadd.f32 %v3362_v40, %v4088_v35 }
 0x17c   :  { %v3031_v45 = vpop.f32.mrb[6].mxu0  ;;  %v4105_v47 = vadd.f32 %v3363_v43, %v4088_v35 }
 0x17d   :  { %v3364_v48 = vadd.f32 %v3031_v45, %v2855_v1  ;;  %v1077_v49 = vpop.f32.mrb[7].mxu0  ;;  %v1226_v50 = vmax.f32 %v4101_v44, 0.0  ;;  %v1382_v44 = vld [vmem:[%s4522_s3 + $0x28] sm:$0xff] }
 0x17e   :  { %v3365_v51 = vadd.f32 %v1077_v49, %v250_v2  ;;  %v1225_v54 = vmax.f32 %v4105_v47, 0.0 }
 0x17f   :  { %1273 = vrot.lane.b32.xlu0 %v1223_v46, %s3530_s26  ;;  %1279 = vrot.lane.b32.xlu1 %v1226_v50, %s3530_s26  ;;  %v4119_v55 = vadd.f32 %v3364_v48, %v4088_v35 }
 0x180   :  { %v4115_v52 = vadd.f32 %v3365_v51, %v4088_v35  ;;  %v3034_v53 = vpop.f32.mrb[8].mxu0 }
 0x181   :  { %v3366_v56 = vadd.f32 %v3034_v53, %v4031_v3  ;;  %v1087_v57 = vpop.f32.mrb[9].mxu0  ;;  %v1228_v62 = vmax.f32 %v4119_v55, 0.0 }
 0x182   :  { %v1227_v58 = vmax.f32 %v4115_v52, 0.0  ;;  %v3367_v59 = vadd.f32 %v1087_v57, %v4033_v4  ;;  %v2559_v52 = vld [vmem:[%s4522_s3 + $0x68] sm:$0xff] }
 0x183   :  { %1277 = vrot.lane.b32.xlu1 %v1225_v54, %s3530_s26  ;;  %v4135_v63 = vadd.f32 %v3366_v56, %v4088_v35  ;;  %v4213_v56 = vadd.f32 %v4077_v28, %v4088_v35 }
 0x184   :  { %v4128_v60 = vadd.f32 %v3367_v59, %v4088_v35  ;;  %1281 = vrot.lane.b32.xlu0 %v1227_v58, %s3530_s26  ;;  %v3037_v61 = vpop.f32.mrb[10].mxu0 }
 0x185   :  { %v3368_v0 = vadd.f32 %v3037_v61, %v4035_v5  ;;  %v1097_v1 = vpop.f32.mrb[11].mxu0  ;;  %v1377_v5 = vld [vmem:[%s4522_s3] sm:$0xff]  ;;  %v1230_v20 = vmax.f32 %v4135_v63, 0.0 }
 0x186   :  { %v1229_v2 = vmax.f32 %v4128_v60, 0.0  ;;  %v3369_v3 = vadd.f32 %v1097_v1, %v4037_v6  ;;  %v1378_v6 = vld [vmem:[%s4522_s3 + $0x8] sm:$0xff] }
 0x187   :  { %1283 = vrot.lane.b32.xlu1 %v1228_v62, %s3530_s26  ;;  %v4157_v21 = vadd.f32 %v3368_v0, %v4088_v35  ;;  %v4160_v24 = vpack.c.bf16 %v1378_v6, %v1377_v5 }
 0x188   :  { %v4144_v4 = vadd.f32 %v3369_v3, %v4088_v35  ;;  %1285 = vrot.lane.b32.xlu0 %v1229_v2, %s3530_s26  ;;  %v3040_v19 = vpop.f32.mrb[12].mxu0 }
 0x189   :  { %v3370_v22 = vadd.f32 %v3040_v19, %v4039_v7  ;;  %v1107_v23 = vpop.f32.mrb[13].mxu0  ;;  %3283 = vmatprep.subr.bf16.mxu1 %v4160_v24  ;;  %v1232_v30 = vmax.f32 %v4157_v21, 0.0 }
 0x18a   :  { %v1231_v25 = vmax.f32 %v4144_v4, 0.0  ;;  %v3371_v27 = vadd.f32 %v1107_v23, %v4041_v8 }
 0x18b   :  { %1287 = vrot.lane.b32.xlu1 %v1230_v20, %s3530_s26  ;;  %v4176_v31 = vadd.f32 %v3370_v22, %v4088_v35 }
 0x18c   :  { %v4169_v29 = vadd.f32 %v3371_v27, %v4088_v35  ;;  %1289 = vrot.lane.b32.xlu0 %v1231_v25, %s3530_s26  ;;  %v3043_v7 = vpop.f32.mrb[14].mxu0 }
 0x18d   :  { %v3372_v8 = vadd.f32 %v3043_v7, %v4043_v9  ;;  %v1117_v32 = vpop.f32.mrb[15].mxu0  ;;  %v1234_v40 = vmax.f32 %v4176_v31, 0.0 }
 0x18e   :  { %v1233_v33 = vmax.f32 %v4169_v29, 0.0  ;;  %v3373_v34 = vadd.f32 %v1117_v32, %v4045_v10 }
 0x18f   :  { %1291 = vrot.lane.b32.xlu1 %v1232_v30, %s3530_s26  ;;  %v4192_v9 = vadd.f32 %v3372_v8, %v4088_v35 }
 0x190   :  { %v4185_v36 = vadd.f32 %v3373_v34, %v4088_v35  ;;  %1293 = vrot.lane.b32.xlu0 %v1233_v33, %s3530_s26  ;;  %v3046_v38 = vpop.f32.mrb[16].mxu0 }
 0x191   :  { %v3374_v41 = vadd.f32 %v3046_v38, %v4047_v11  ;;  %v1127_v10 = vpop.f32.mrb[17].mxu0  ;;  %v1236_v51 = vmax.f32 %v4192_v9, 0.0 }
 0x192   :  { %v1235_v43 = vmax.f32 %v4185_v36, 0.0  ;;  %v3375_v45 = vadd.f32 %v1127_v10, %v4049_v12 }
 0x193   :  { %1295 = vrot.lane.b32.xlu1 %v1234_v40, %s3530_s26  ;;  %v4208_v11 = vadd.f32 %v3374_v41, %v4088_v35 }
 0x194   :  { %v4201_v48 = vadd.f32 %v3375_v45, %v4088_v35  ;;  %1297 = vrot.lane.b32.xlu0 %v1235_v43, %s3530_s26  ;;  %v3049_v49 = vpop.f32.mrb[18].mxu0 }
 0x195   :  { %v3376_v53 = vadd.f32 %v3049_v49, %v4051_v13  ;;  %v1137_v12 = vpop.f32.mrb[19].mxu0  ;;  %v4225_v13 = vadd.f32 %v4075_v26, %v4088_v35  ;;  %v1238_v28 = vmax.f32 %v4208_v11, 0.0  ;;  %v2561_v11 = vld [vmem:[%s4522_s3 + $0x78] sm:$0xff] }
 0x196   :  { %v1237_v57 = vmax.f32 %v4201_v48, 0.0  ;;  %v3377_v59 = vadd.f32 %v1137_v12, %v4053_v14  ;;  %v1221_v14 = vmax.f32 %v4213_v56, 0.0  ;;  %v2560_v48 = vld [vmem:[%s4522_s3 + $0x70] sm:$0xff]  ;;  %v2562_v56 = vld [vmem:[%s4522_s3 + $0x80] sm:$0xff] }
 0x197   :  { %1299 = vrot.lane.b32.xlu1 %v1236_v51, %s3530_s26  ;;  %v1222_v5 = vmax.f32 %v4225_v13, 0.0  ;;  %v2563_v13 = vld [vmem:[%s4522_s3 + $0x88] sm:$0xff] }
 0x198   :  { %1301 = vrot.lane.b32.xlu0 %v1237_v57, %s3530_s26  ;;  %v3052_v61 = vpop.f32.mrb[20].mxu0  ;;  %v4231_v3 = vadd.f32 %v3377_v59, %v4088_v35 }
 0x199   :  { %v3378_v0 = vadd.f32 %v3052_v61, %v4055_v15  ;;  %v1147_v1 = vpop.f32.mrb[21].mxu0  ;;  %v4242_v15 = vadd.f32 %v3376_v53, %v4088_v35  ;;  %v1379_v61 = vld [vmem:[%s4522_s3 + $0x10] sm:$0xff] }
 0x19a   :  { %v3379_v19 = vadd.f32 %v1147_v1, %v4057_v16  ;;  %v1239_v23 = vmax.f32 %v4231_v3, 0.0 }
 0x19b   :  { %1303 = vrot.lane.b32.xlu1 %v1238_v28, %s3530_s26  ;;  %v1240_v7 = vmax.f32 %v4242_v15, 0.0  ;;  %v2589_v15 = vld [vmem:[%s4522_s3 + $0xd8] sm:$0xff] }
 0x19c   :  { %1269 = vrot.lane.b32.xlu0 %v1221_v14, %s3530_s26  ;;  %v3055_v26 = vpop.f32.mrb[22].mxu0  ;;  %v4247_v16 = vadd.f32 %v3379_v19, %v4088_v35 }
 0x19d   :  { %v3380_v6 = vadd.f32 %v3055_v26, %v4059_v17  ;;  %v1157_v22 = vpop.f32.mrb[23].mxu0  ;;  %v4258_v17 = vadd.f32 %v3378_v0, %v4088_v35  ;;  %v1380_v0 = vld [vmem:[%s4522_s3 + $0x18] sm:$0xff]  ;;  %v1381_v26 = vld [vmem:[%s4522_s3 + $0x20] sm:$0xff] }
 0x19e   :  { %v3381_v27 = vadd.f32 %v1157_v22, %v4061_v18  ;;  %v1241_v8 = vmax.f32 %v4247_v16, 0.0  ;;  %v3290_v22 = vpack.c.bf16 %v1382_v44, %v1381_v26  ;;  %v2576_v26 = vld [vmem:[%s4522_s3 + $0xb0] sm:$0xff]  ;;  %v2577_v44 = vld [vmem:[%s4522_s3 + $0xb8] sm:$0xff] }
 0x19f   :  { %1271 = vrot.lane.b32.xlu1 %v1222_v5, %s3530_s26  ;;  %v1242_v18 = vmax.f32 %v4258_v17, 0.0  ;;  %v4272_v34 = vadd.f32 %v3380_v6, %v4088_v35 }
 0x1a0   :  { %1305 = vrot.lane.b32.xlu0 %v1239_v23, %s3530_s26  ;;  %v4262_v32 = vadd.f32 %v3381_v27, %v4088_v35 }
 0x1a1   :  { %v1244_v41 = vmax.f32 %v4272_v34, 0.0 }
 0x1a2   :  { %v1243_v38 = vmax.f32 %v4262_v32, 0.0  ;;  %v3533_v32 = vmov 0.0  }
 0x1a3   :  { %1307 = vrot.lane.b32.xlu1 %v1240_v7, %s3530_s26 }
 0x1a4   :  { %1309 = vrot.lane.b32.xlu0 %v1241_v8, %s3530_s26 }
 0x1a7   :  { %1311 = vrot.lane.b32.xlu1 %v1242_v18, %s3530_s26 }
 0x1a8   :  { %1313 = vrot.lane.b32.xlu0 %v1243_v38, %s3530_s26 }
 0x1ab   :  { %1315 = vrot.lane.b32.xlu1 %v1244_v41, %s3530_s26 }
 0x1ed   :  { %v1276_v10 = vpop.permute.xlu0 %1275 }
 0x1ee   :  { %v1344_v49 = vmax.f32 %v1224_v42, %v1276_v10  ;;  %v2558_v10 = vld [vmem:[%s4522_s3 + $0x60] sm:$0xff] }
 0x1f1   :  { %v1274_v45 = vpop.permute.xlu0 %1273  ;;  %v1280_v35 = vpop.permute.xlu1 %1279 }
 0x1f2   :  { %v1343_v53 = vmax.f32 %v1223_v46, %v1274_v45  ;;  %v1346_v1 = vmax.f32 %v1226_v50, %v1280_v35  ;;  %v3286_v46 = vpack.c.bf16 %v1380_v0, %v1379_v61  ;;  %v3294_v45 = vpack.c.bf16 %v2559_v52, %v2558_v10 }
 0x1f4   :  { %v4289_v12 = vmax.f32 %v1343_v53, %v1344_v49 }
 0x1f5   :  { %v1278_v59 = vpop.permute.xlu1 %1277 }
 0x1f6   :  { %v1345_v37 = vmax.f32 %v1225_v54, %v1278_v59  ;;  %3068 = vmatprep.mubr.msk.f32.mxu1 %vm1390_vm4, %v4289_v12  ;;  %v1282_v39 = vpop.permute.xlu0 %1281 }
 0x1f7   :  { %v1347_v47 = vmax.f32 %v1227_v58, %v1282_v39  ;;  %v2574_v39 = vld [vmem:[%s4522_s3 + $0xa0] sm:$0xff] }
 0x1f8   :  { %v4303_v42 = vmax.f32 %v1345_v37, %v1346_v1  ;;  %v2573_v37 = vld [vmem:[%s4522_s3 + $0x98] sm:$0xff] }
 0x1f9   :  { %v1284_v19 = vpop.permute.xlu1 %1283 }
 0x1fa   :  { %v1348_v50 = vmax.f32 %v1228_v62, %v1284_v19  ;;  %3069 = vmatmul.mubr.msk.f32.vlgmr.msra.gmra.mrb[24].mxu1 %vm1390_vm4, %v4303_v42  ;;  %v1286_v54 = vpop.permute.xlu0 %1285 }
 0x1fb   :  { %3285 = vmatpush3.bf16.msra.mxu1 %v4160_v24  ;;  %v1349_v55 = vmax.f32 %v1229_v2, %v1286_v54  ;;  %v2587_v54 = vld [vmem:[%s4522_s3 + $0xc8] sm:$0xff] }
 0x1fc   :  { %v4318_v6 = vmax.f32 %v1347_v47, %v1348_v50  ;;  %3287 = vmatprep.subr.bf16.mxu1 %v3286_v46  ;;  %v3314_v47 = vpack.c.bf16 %v2577_v44, %v2576_v26 }
 0x1fd   :  { %v1288_v27 = vpop.permute.xlu1 %1287 }
 0x1fe   :  { %v1350_v58 = vmax.f32 %v1230_v20, %v1288_v27  ;;  %3071 = vmatprep.mubr.msk.f32.mxu1 %vm1390_vm4, %v4318_v6  ;;  %v1290_v62 = vpop.permute.xlu0 %1289 }
 0x1ff   :  { %3289 = vmatpush3.bf16.msra.mxu1 %v3286_v46  ;;  %v1351_v49 = vmax.f32 %v1231_v25, %v1290_v62  ;;  %v2575_v46 = vld [vmem:[%s4522_s3 + $0xa8] sm:$0xff] }
 0x200   :  { %v4332_v24 = vmax.f32 %v1349_v55, %v1350_v58  ;;  %3291 = vmatprep.subr.bf16.mxu1 %v3290_v22  ;;  %v3310_v19 = vpack.c.bf16 %v2575_v46, %v2574_v39  ;;  %v2588_v58 = vld [vmem:[%s4522_s3 + $0xd0] sm:$0xff]  ;;  %v2152_v46 = vld [vmem:[#allocation2 + $0x28] sm:$0xff] }
 0x201   :  { %v1292_v35 = vpop.permute.xlu1 %1291  ;;  %v3322_v3 = vpack.c.bf16 %v2589_v15, %v2588_v58  ;;  %v2151_v39 = vld [vmem:[#allocation2 + $0x20] sm:$0xff]  ;;  %v2231_v15 = vld [vmem:[#allocation2 + $0x48] sm:$0xff] }
 0x202   :  { %v1352_v60 = vmax.f32 %v1232_v30, %v1292_v35  ;;  %3072 = vmatmul.mubr.msk.f32.gmra.mrb[26].mxu1 %vm1390_vm4, %v4332_v24  ;;  %v1294_v63 = vpop.permute.xlu0 %1293  ;;  %v2230_v58 = vld [vmem:[#allocation2 + $0x40] sm:$0xff] }
 0x203   :  { %3293 = vmatpush3.bf16.msra.mxu1 %v3290_v22  ;;  %v1353_v53 = vmax.f32 %v1233_v33, %v1294_v63  ;;  %v2065_v63 = vld [vmem:[#allocation2] sm:$0xff] }
 0x204   :  { %v4340_v2 = vmax.f32 %v1351_v49, %v1352_v60  ;;  %3295 = vmatprep.subr.bf16.mxu1 %v3294_v45 }
 0x205   :  { %v1296_v20 = vpop.permute.xlu1 %1295 }
 0x206   :  { %v1354_v59 = vmax.f32 %v1234_v40, %v1296_v20  ;;  %3074 = vmatprep.mubr.msk.f32.mxu1 %vm1390_vm4, %v4340_v2  ;;  %v1298_v4 = vpop.permute.xlu0 %1297  ;;  %v2067_v20 = vld [vmem:[#allocation2 + $0x10] sm:$0xff] }
 0x207   :  { %v1355_v30 = vmax.f32 %v1235_v43, %v1298_v4  ;;  %v2068_v4 = vld [vmem:[#allocation2 + $0x18] sm:$0xff] }
 0x208   :  { %v4348_v21 = vmax.f32 %v1353_v53, %v1354_v59  ;;  %v3531_v53 = vmov 0.0|0.0   ;;  %v3334_v34 = vpack.c.bf16 %v2068_v4, %v2067_v20 }
 0x209   :  { %v1300_v25 = vpop.permute.xlu1 %1299 }
 0x20a   :  { %v1356_v61 = vmax.f32 %v1236_v51, %v1300_v25  ;;  %3075 = vmatmul.mubr.msk.f32.gmra.mrb[28].mxu1 %vm1390_vm4, %v4348_v21  ;;  %v1302_v29 = vpop.permute.xlu0 %1301 }
 0x20b   :  { %v1357_v40 = vmax.f32 %v1237_v57, %v1302_v29 }
 0x20c   :  { %v4356_v33 = vmax.f32 %v1355_v30, %v1356_v61 }
 0x20d   :  { %v1304_v31 = vpop.permute.xlu1 %1303 }
 0x20e   :  { %v1358_v0 = vmax.f32 %v1238_v28, %v1304_v31  ;;  %3077 = vmatprep.mubr.msk.f32.mxu1 %vm1390_vm4, %v4356_v33  ;;  %v1270_v36 = vpop.permute.xlu0 %1269  ;;  %v3298_v28 = vpack.c.bf16 %v2561_v11, %v2560_v48 }
 0x20f   :  { %v1341_v51 = vmax.f32 %v1221_v14, %v1270_v36  ;;  %v3302_v14 = vpack.c.bf16 %v2563_v13, %v2562_v56 }
 0x210   :  { %v4364_v43 = vmax.f32 %v1357_v40, %v1358_v0 }
 0x211   :  { %v1272_v9 = vpop.permute.xlu1 %1271 }
 0x212   :  { %v1342_v1 = vmax.f32 %v1222_v5, %v1272_v9  ;;  %3078 = vmatmul.mubr.msk.f32.gmra.mrb[30].mxu1 %vm1390_vm4, %v4364_v43  ;;  %v2572_v5 = vld [vmem:[%s4522_s3 + $0x90] sm:$0xff]  ;;  %v1306_v22 = vpop.permute.xlu0 %1305 }
 0x213   :  { %v1359_v52 = vmax.f32 %v1239_v23, %v1306_v22  ;;  %v2590_v23 = vld [vmem:[%s4522_s3 + $0xe0] sm:$0xff] }
 0x214   :  { %v1365_v57 = vmax.f32 %v1341_v51, %v1342_v1 }
 0x215   :  { %v1308_v50 = vpop.permute.xlu1 %1307 }
 0x216   :  { %3092 = vmatprep.mubr.msk.f32.mxu1 %vm1390_vm4, %v1365_v57  ;;  %v1360_v27 = vmax.f32 %v1240_v7, %v1308_v50  ;;  %v2591_v7 = vld [vmem:[%s4522_s3 + $0xe8] sm:$0xff] }
 0x217   :  { %3093 = vmatmul.mubr.msk.f32.vlgmr.msra.gmra.mrb[24].mxu1 %vm1390_vm4, %v4289_v12  ;;  %v3306_v12 = vpack.c.bf16 %v2573_v37, %v2572_v5  ;;  %v3326_v62 = vpack.c.bf16 %v2591_v7, %v2590_v23  ;;  %v2232_v7 = vld [vmem:[#allocation2 + $0x50] sm:$0xff] }
 0x218   :  { %3095 = vmatprep.mubr.msk.f32.mxu1 %vm1390_vm4, %v4303_v42  ;;  %3297 = vmatpush3.bf16.msra.mxu1 %v3294_v45  ;;  %v1374_v55 = vmax.f32 %v1359_v52, %v1360_v27 }
 0x219   :  { %3299 = vmatprep.subr.bf16.mxu1 %v3298_v28  ;;  %v1312_v45 = vpop.permute.xlu1 %1311 }
 0x21a   :  { %v1362_v35 = vmax.f32 %v1242_v18, %v1312_v45 }
 0x21b   :  { %3096 = vmatmul.mubr.msk.f32.gmra.mrb[26].mxu1 %vm1390_vm4, %v4318_v6 }
 0x21c   :  { %3098 = vmatprep.mubr.msk.f32.mxu1 %vm1390_vm4, %v4332_v24  ;;  %3301 = vmatpush3.bf16.msra.mxu1 %v3298_v28 }
 0x21d   :  { %3303 = vmatprep.subr.bf16.mxu1 %v3302_v14  ;;  %v1316_v16 = vpop.permute.xlu1 %1315 }
 0x21f   :  { %3099 = vmatmul.mubr.msk.f32.gmra.mrb[28].mxu1 %vm1390_vm4, %v4340_v2 }
 0x220   :  { %3101 = vmatprep.mubr.msk.f32.mxu1 %vm1390_vm4, %v4348_v21  ;;  %3305 = vmatpush3.bf16.msra.mxu1 %v3302_v14 }
 0x221   :  { %3307 = vmatprep.subr.bf16.mxu1 %v3306_v12 }
 0x223   :  { %3102 = vmatmul.mubr.msk.f32.gmra.mrb[30].mxu1 %vm1390_vm4, %v4356_v33 }
 0x224   :  { %3116 = vmatprep.mubr.msk.f32.mxu1 %vm1390_vm4, %v4303_v42  ;;  %v2586_v42 = vld [vmem:[%s4522_s3 + $0xc0] sm:$0xff] }
 0x225   :  { %v3318_v10 = vpack.c.bf16 %v2587_v54, %v2586_v42  ;;  %v2153_v42 = vld [vmem:[#allocation2 + $0x30] sm:$0xff]  ;;  %v2154_v54 = vld [vmem:[#allocation2 + $0x38] sm:$0xff] }
 0x227   :  { %3117 = vmatmul.mubr.msk.f32.vlgmr.msra.gmra.mrb[24].mxu1 %vm1390_vm4, %v4318_v6 }
 0x228   :  { %3119 = vmatprep.mubr.msk.f32.mxu1 %vm1390_vm4, %v4332_v24  ;;  %3309 = vmatpush3.bf16.msra.mxu1 %v3306_v12 }
 0x229   :  { %3311 = vmatprep.subr.bf16.mxu1 %v3310_v19 }
 0x22b   :  { %3120 = vmatmul.mubr.msk.f32.gmra.mrb[26].mxu1 %vm1390_vm4, %v4340_v2 }
 0x22c   :  { %3122 = vmatprep.mubr.msk.f32.mxu1 %vm1390_vm4, %v4348_v21  ;;  %3313 = vmatpush3.bf16.msra.mxu1 %v3310_v19 }
 0x22d   :  { %3315 = vmatprep.subr.bf16.mxu1 %v3314_v47 }
 0x22f   :  { %3123 = vmatmul.mubr.msk.f32.gmra.mrb[28].mxu1 %vm1390_vm4, %v4356_v33 }
 0x230   :  { %3125 = vmatprep.mubr.msk.f32.mxu1 %vm1390_vm4, %v4364_v43  ;;  %3317 = vmatpush3.bf16.msra.mxu1 %v3314_v47  ;;  %v3337_v47 = vpack.c.bf16 %v2152_v46, %v2151_v39 }
 0x231   :  { %3319 = vmatprep.subr.bf16.mxu1 %v3318_v10 }
 0x233   :  { %3126 = vmatmul.mubr.msk.f32.gmra.mrb[30].mxu1 %vm1390_vm4, %v1374_v55 }
 0x234   :  { %3140 = vmatprep.mubr.msk.f32.mxu1 %vm1390_vm4, %v4318_v6  ;;  %v1310_v6 = vpop.permute.xlu0 %1309 }
 0x235   :  { %v1361_v49 = vmax.f32 %v1241_v8, %v1310_v6  ;;  %v1364_v8 = vmax.f32 %v1244_v41, %v1316_v16  ;;  %v2309_v16 = vld [vmem:[#allocation2 + $0x60] sm:$0xff] }
 0x237   :  { %3141 = vmatmul.mubr.msk.f32.vlgmr.msra.gmra.mrb[24].mxu1 %vm1390_vm4, %v4332_v24  ;;  %v1375_v60 = vmax.f32 %v1361_v49, %v1362_v35 }
 0x238   :  { %3143 = vmatprep.mubr.msk.f32.mxu1 %vm1390_vm4, %v4340_v2  ;;  %3321 = vmatpush3.bf16.msra.mxu1 %v3318_v10  ;;  %v1314_v17 = vpop.permute.xlu0 %1313  ;;  %v3340_v10 = vpack.c.bf16 %v2154_v54, %v2153_v42 }
 0x239   :  { %3323 = vmatprep.subr.bf16.mxu1 %v3322_v3  ;;  %v1363_v18 = vmax.f32 %v1243_v38, %v1314_v17  ;;  %v2600_v38 = vld [vmem:[%s4523_s4] ss:$0 sm:$0xff]  ;;  %v2310_v17 = vld [vmem:[#allocation2 + $0x68] sm:$0xff] }
 0x23b   :  { %3144 = vmatmul.mubr.msk.f32.gmra.mrb[26].mxu1 %vm1390_vm4, %v4348_v21 }
 0x23c   :  { %3146 = vmatprep.mubr.msk.f32.mxu1 %vm1390_vm4, %v4356_v33  ;;  %3325 = vmatpush3.bf16.msra.mxu1 %v3322_v3  ;;  %v3343_v3 = vpack.c.bf16 %v2231_v15, %v2230_v58 }
 0x23d   :  { %3327 = vmatprep.subr.bf16.mxu1 %v3326_v62 }
 0x23f   :  { %3147 = vmatmul.mubr.msk.f32.gmra.mrb[28].mxu1 %vm1390_vm4, %v4364_v43 }
 0x240   :  { %3149 = vmatprep.mubr.msk.f32.mxu1 %vm1390_vm4, %v1374_v55  ;;  %3329 = vmatpush3.bf16.msra.mxu1 %v3326_v62  ;;  %v2233_v62 = vld [vmem:[#allocation2 + $0x58] sm:$0xff] }
 0x241   :  { %3330 = vmatprep.subr.bf16.mxu1 %v3531_v53  ;;  %v3346_v35 = vpack.c.bf16 %v2233_v62, %v2232_v7 }
 0x243   :  { %3150 = vmatmul.mubr.msk.f32.gmra.mrb[30].mxu1 %vm1390_vm4, %v1375_v60 }
 0x244   :  { %3164 = vmatprep.mubr.msk.f32.mxu1 %vm1390_vm4, %v4332_v24  ;;  %v1376_v24 = vmax.f32 %v1363_v18, %v1364_v8  ;;  %v3349_v8 = vpack.c.bf16 %v2310_v17, %v2309_v16 }
 0x247   :  { %3165 = vmatmul.mubr.msk.f32.vlgmr.msra.gmra.mrb[24].mxu1 %vm1390_vm4, %v4340_v2  ;;  %v2066_v2 = vld [vmem:[#allocation2 + $0x8] sm:$0xff] }
 0x248   :  { %3167 = vmatprep.mubr.msk.f32.mxu1 %vm1390_vm4, %v4348_v21  ;;  %v3331_v59 = vpack.c.bf16 %v2066_v2, %v2065_v63  ;;  %v2312_v63 = vld [vmem:[#allocation2 + $0x78] sm:$0xff] }
 0x24a   :  { %3332 = vmatpush3.bf16.msra.mxu1 %v3331_v59 }
 0x24b   :  { %3168 = vmatmul.mubr.msk.f32.gmra.mrb[26].mxu1 %vm1390_vm4, %v4356_v33  ;;  %3333 = vmatprep.subr.bf16.mxu1 %v3531_v53 }
 0x24c   :  { %3170 = vmatprep.mubr.msk.f32.mxu1 %vm1390_vm4, %v4364_v43 }
 0x24e   :  { %3335 = vmatpush3.bf16.msra.mxu1 %v3334_v34 }
 0x24f   :  { %3171 = vmatmul.mubr.msk.f32.gmra.mrb[28].mxu1 %vm1390_vm4, %v1374_v55  ;;  %3336 = vmatprep.subr.bf16.mxu1 %v3531_v53 }
 0x250   :  { %3173 = vmatprep.mubr.msk.f32.mxu1 %vm1390_vm4, %v1375_v60 }
 0x253   :  { %3174 = vmatmul.mubr.msk.f32.gmra.mrb[30].mxu1 %vm1390_vm4, %v1376_v24  ;;  %v2311_v24 = vld [vmem:[#allocation2 + $0x70] sm:$0xff] }
 0x254   :  { %3184 = vmatprep.mubr.msk.f32.mxu1 %vm3532_vm5, %v3533_v32  ;;  %v3352_v59 = vpack.c.bf16 %v2312_v63, %v2311_v24 }
 0x31a   :  { %v3166_v41 = vpop.f32.mrb[24].mxu1 }
 0x31b   :  { %v2005_v21 = vadd.f32 %v3166_v41, %v2600_v38  ;;  %v1950_v25 = vpop.f32.mrb[25].mxu1  ;;  %v2602_v41 = vld [vmem:[%s4525_s6] ss:$0 sm:$0xff] }
 0x31c   :  { %v2004_v30 = vadd.f32 %v2600_v38, %v1950_v25 }
 0x31d   :  { %v2013_v61 = vmax.f32 %v2005_v21, 0.0 }
 0x31e   :  { %v2012_v29 = vmax.f32 %v2004_v30, 0.0  ;;  %v3169_v33 = vpop.f32.mrb[26].mxu1 }
 0x31f   :  { %v2007_v31 = vadd.f32 %v3169_v33, %v2600_v38  ;;  %v1960_v40 = vpop.f32.mrb[27].mxu1  ;;  %2030 = vrot.lane.b32.xlu1 %v2013_v61, %s3534_s5 }
 0x320   :  { %v2006_v0 = vadd.f32 %v2600_v38, %v1960_v40  ;;  %2028 = vrot.lane.b32.xlu0 %v2012_v29, %s3534_s5 }
 0x321   :  { %v2015_v36 = vmax.f32 %v2007_v31, 0.0 }
 0x322   :  { %v2014_v43 = vmax.f32 %v2006_v0, 0.0  ;;  %v3172_v9 = vpop.f32.mrb[28].mxu1 }
 0x323   :  { %v2009_v51 = vadd.f32 %v3172_v9, %v2600_v38  ;;  %v1970_v1 = vpop.f32.mrb[29].mxu1  ;;  %2034 = vrot.lane.b32.xlu1 %v2015_v36, %s3534_s5 }
 0x324   :  { %v2008_v48 = vadd.f32 %v2600_v38, %v1970_v1  ;;  %2032 = vrot.lane.b32.xlu0 %v2014_v43, %s3534_s5 }
 0x325   :  { %v2017_v11 = vmax.f32 %v2009_v51, 0.0 }
 0x326   :  { %v2016_v57 = vmax.f32 %v2008_v48, 0.0  ;;  %v3175_v28 = vpop.f32.mrb[30].mxu1 }
 0x327   :  { %v2011_v56 = vadd.f32 %v3175_v28, %v2600_v38  ;;  %2038 = vrot.lane.b32.xlu1 %v2017_v11, %s3534_s5  ;;  %v1980_v13 = vpop.f32.mrb[31].mxu1 }
 0x328   :  { %v2010_v14 = vadd.f32 %v2600_v38, %v1980_v13  ;;  %2036 = vrot.lane.b32.xlu0 %v2016_v57, %s3534_s5 }
 0x329   :  { %v2019_v5 = vmax.f32 %v2011_v56, 0.0 }
 0x32a   :  { %v2018_v37 = vmax.f32 %v2010_v14, 0.0 }
 0x32b   :  { %2042 = vrot.lane.b32.xlu1 %v2019_v5, %s3534_s5 }
 0x32c   :  { %2040 = vrot.lane.b32.xlu0 %v2018_v37, %s3534_s5 }
 0x391   :  { %v2031_v12 = vpop.permute.xlu1 %2030 }
 0x392   :  { %v2053_v19 = vmax.f32 %v2013_v61, %v2031_v12  ;;  %v2029_v26 = vpop.permute.xlu0 %2028 }
 0x393   :  { %v2052_v44 = vmax.f32 %v2012_v29, %v2029_v26 }
 0x395   :  { %v2060_v50 = vmax.f32 %v2052_v44, %v2053_v19  ;;  %v2035_v22 = vpop.permute.xlu1 %2034 }
 0x396   :  { %v2033_v27 = vpop.permute.xlu0 %2032  ;;  %v2055_v52 = vmax.f32 %v2015_v36, %v2035_v22 }
 0x397   :  { %3185 = vmatmul.mubr.msk.f32.vlgmr.msra.gmra.mrb[32].mxu1 %vm2069_vm6, %v2060_v50  ;;  %v2054_v55 = vmax.f32 %v2014_v43, %v2033_v27 }
 0x398   :  { %3338 = vmatpush3.bf16.msra.mxu1 %v3337_v47  ;;  %3195 = vmatprep.mubr.msk.f32.mxu1 %vm3532_vm5, %v3533_v32 }
 0x399   :  { %3339 = vmatprep.subr.bf16.mxu1 %v3531_v53  ;;  %v2061_v23 = vmax.f32 %v2054_v55, %v2055_v52  ;;  %v2039_v45 = vpop.permute.xlu1 %2038 }
 0x39a   :  { %v2037_v6 = vpop.permute.xlu0 %2036  ;;  %v2057_v49 = vmax.f32 %v2017_v11, %v2039_v45 }
 0x39b   :  { %v2056_v60 = vmax.f32 %v2016_v57, %v2037_v6 }
 0x39c   :  { %3341 = vmatpush3.bf16.msra.mxu1 %v3340_v10 }
 0x39d   :  { %3342 = vmatprep.subr.bf16.mxu1 %v3531_v53  ;;  %v2062_v18 = vmax.f32 %v2056_v60, %v2057_v49  ;;  %v2043_v2 = vpop.permute.xlu1 %2042 }
 0x39e   :  { %v2041_v20 = vpop.permute.xlu0 %2040  ;;  %v2059_v4 = vmax.f32 %v2019_v5, %v2043_v2 }
 0x39f   :  { %3196 = vmatmul.mubr.msk.f32.vlgmr.msra.gmra.mrb[32].mxu1 %vm2069_vm6, %v2061_v23  ;;  %v2058_v34 = vmax.f32 %v2018_v37, %v2041_v20 }
 0x3a0   :  { %3344 = vmatpush3.bf16.msra.mxu1 %v3343_v3  ;;  %3206 = vmatprep.mubr.msk.f32.mxu1 %vm3532_vm5, %v3533_v32 }
 0x3a1   :  { %3345 = vmatprep.subr.bf16.mxu1 %v3531_v53  ;;  %v2063_v38 = vmax.f32 %v2058_v34, %v2059_v4 }
 0x3a4   :  { %3347 = vmatpush3.bf16.msra.mxu1 %v3346_v35 }
 0x3a5   :  { %3348 = vmatprep.subr.bf16.mxu1 %v3531_v53 }
 0x3a7   :  { %3207 = vmatmul.mubr.msk.f32.vlgmr.msra.gmra.mrb[32].mxu1 %vm2069_vm6, %v2062_v18 }
 0x3a8   :  { %3350 = vmatpush3.bf16.msra.mxu1 %v3349_v8  ;;  %3217 = vmatprep.mubr.msk.f32.mxu1 %vm3532_vm5, %v3533_v32 }
 0x3a9   :  { %3351 = vmatprep.subr.bf16.mxu1 %v3531_v53 }
 0x3ac   :  { %3353 = vmatpush3.bf16.msra.mxu1 %v3352_v59 }
 0x3af   :  { %3218 = vmatmul.mubr.msk.f32.vlgmr.msra.gmra.mrb[32].mxu1 %vm2069_vm6, %v2063_v38 }
 0x482   :  { %v2382_v21 = vpop.f32.mrb[32].mxu1 }
 0x483   :  { %v3382_v25 = vadd.f32 %v2602_v41, %v2382_v21  ;;  %v3219_v30 = vpop.f32.mrb[33].mxu1 }
 0x485   :  { %v2387_v61 = vmax.f32 %v3382_v25, 0.0 }
 0x487   :  { %2388 = vst.msk [vmem:[%s4526_s7] sm:$0xff] %vm2069_vm6, %v2387_v61 }
 0x488   :  { %2393 = vsyncpa [#allocation3], 1 }

</bundles_post_ra>
